<compile_context>
chip_gen: v7x
topology: tpu7x:2x2x1
jax: 0.10.0
libtpu: 0.0.40
codegen_flags: <defaults>
</compile_context>

<pallas_src>
import math
import jax
import jax.numpy as jnp
from jax import lax
from jax.experimental import pallas as pl
from jax.experimental.pallas import tpu as pltpu

LAYERS = [1, 32, 32, 32, 32, 32, 3]
K_LAYERS = [1, 32, 32, 32, 32, 32, 1]

FUSED_WIDTH = 128          # 4 MLPs x 32 hidden units, lane-dense
OUT_WIDTH = 128            # padded lane-dense output; cols 0..5 = y1,y2,y3,k1,k2,k3
N_HIDDEN_LAYERS = 4        # hidden->hidden Linear+GELU layers (after the first layer)
N_MATMUL_LAYERS = N_HIDDEN_LAYERS + 1   # hidden layers + final layer
OUT_DIMS = [3, 1, 1, 1]    # per-MLP output widths (net, k1, k2, k3)


def _gelu_exact(x):
    # Exact GELU (matches torch.nn.GELU(approximate='none'))
    return 0.5 * x * (1.0 + lax.erf(x * 0.7071067811865476))


# ---------------------------------------------------------------------------
# Fused kernel: all 4 MLPs in one pass over a (TN, 1) tile of t.
# ---------------------------------------------------------------------------
def fused_pitlnn_kernel(t_ref, wstack_ref, vec_ref, out_ref):
    x = t_ref[...]                                       # (TN, 1)
    vecs = vec_ref[...]                                  # (8, 128) one vreg tile

    # First layer: input dim == 1 => broadcast multiply on the VPU (no matmul).
    h = x * vecs[0:1, :] + vecs[1:2, :]                  # (TN, 128)
    h = _gelu_exact(h)

    # 4 block-diagonal hidden layers, statically unrolled; biases in vecs[2..5].
    for l in range(N_HIDDEN_LAYERS):
        h = jnp.dot(h, wstack_ref[l],
                    preferred_element_type=jnp.float32) + vecs[l + 2:l + 3, :]
        h = _gelu_exact(h)

    # Final layer (padded to 128 output lanes => unmasked store).
    out = jnp.dot(h, wstack_ref[N_HIDDEN_LAYERS],
                  preferred_element_type=jnp.float32) + vecs[6:7, :]
    out_ref[...] = out.astype(out_ref.dtype)             # (TN, 128) lane-dense


# ---------------------------------------------------------------------------
# Parameter init (mirrors PyTorch module shapes / init scheme) and packing.
# ---------------------------------------------------------------------------
def init_net(key, layers):
    """Hidden Linear: U(-1/sqrt(fan_in), 1/sqrt(fan_in)) (PyTorch default).
    Final Linear: Xavier-uniform weight, zero bias (as in initialize_NN).
    Weights stored (in, out); biases stored (1, out)."""
    params = []
    keys = jax.random.split(key, 2 * (len(layers) - 1))
    for i in range(len(layers) - 1):
        fan_in, fan_out = layers[i], layers[i + 1]
        wk, bk = keys[2 * i], keys[2 * i + 1]
        if i == len(layers) - 2:
            limit = math.sqrt(6.0 / (fan_in + fan_out))
            w = jax.random.uniform(wk, (fan_in, fan_out), jnp.float32,
                                   minval=-limit, maxval=limit)
            b = jnp.zeros((1, fan_out), jnp.float32)
        else:
            limit = 1.0 / math.sqrt(fan_in)
            w = jax.random.uniform(wk, (fan_in, fan_out), jnp.float32,
                                   minval=-limit, maxval=limit)
            b = jax.random.uniform(bk, (1, fan_out), jnp.float32,
                                   minval=-limit, maxval=limit)
        params.append((w, b))
    return params


def pack_params(net_params, k1_params, k2_params, k3_params):
    """Pack the 4 MLPs into two fused slabs: (5,128,128) weights, (8,128) vectors."""
    all_p = [net_params, k1_params, k2_params, k3_params]

    # First layer (in=1): simple lane concatenation.
    w_first = jnp.concatenate([p[0][0] for p in all_p], axis=1)   # (1, 128)
    b_first = jnp.concatenate([p[0][1] for p in all_p], axis=1)   # (1, 128)

    # Hidden layers: block-diagonal (128, 128) per layer.
    w_stack = jnp.zeros((N_MATMUL_LAYERS, FUSED_WIDTH, OUT_WIDTH), jnp.float32)
    b_hidden = []
    for l in range(1, 1 + N_HIDDEN_LAYERS):
        for m in range(4):
            w_stack = w_stack.at[l - 1,
                                 m * 32:(m + 1) * 32,
                                 m * 32:(m + 1) * 32].set(all_p[m][l][0])
        b_hidden.append(jnp.concatenate([all_p[m][l][1] for m in range(4)],
                                        axis=1))                  # (1, 128)

    # Final layer: map each MLP's 32-wide block to its output columns,
    # padded to 128 lanes so the output store is lane-dense.
    b_final = jnp.zeros((1, OUT_WIDTH), jnp.float32)
    col = 0
    for m, od in enumerate(OUT_DIMS):
        w_stack = w_stack.at[N_HIDDEN_LAYERS,
                             m * 32:(m + 1) * 32,
                             col:col + od].set(all_p[m][-1][0])
        b_final = b_final.at[:, col:col + od].set(all_p[m][-1][1])
        col += od

    # Vector slab: one (8,128) vreg tile.
    vec_slab = jnp.concatenate(
        [w_first, b_first] + b_hidden + [b_final,
                                         jnp.zeros((1, FUSED_WIDTH), jnp.float32)],
        axis=0)                                                   # (8, 128)
    return (w_stack, vec_slab)


# ---------------------------------------------------------------------------
# Wrapper: single pallas_call, lane-dense output, slicing done outside.
# ---------------------------------------------------------------------------
def pitlnn_forward(t, packed, tile_n=1024):
    N = t.shape[0]
    w_stack, vec_slab = packed

    # Small batches: one grid step with the whole (8-padded) batch.
    # Large batches: tile_n rows per step, parallel grid axis (megacore).
    if N <= tile_n:
        tn = max(8, ((N + 7) // 8) * 8)
    else:
        tn = tile_n
    grid_n = pl.cdiv(N, tn)
    padded_n = grid_n * tn
    t_in = t if padded_n == N else jnp.pad(t, ((0, padded_n - N), (0, 0)))

    out = pl.pallas_call(
        fused_pitlnn_kernel,
        out_shape=jax.ShapeDtypeStruct((padded_n, OUT_WIDTH), jnp.float32),
        grid=(grid_n,),
        in_specs=[
            pl.BlockSpec((tn, 1), lambda i: (i, 0)),                       # t tile
            pl.BlockSpec((N_MATMUL_LAYERS, FUSED_WIDTH, OUT_WIDTH),
                         lambda i: (0, 0, 0)),                             # weights
            pl.BlockSpec((8, FUSED_WIDTH), lambda i: (0, 0)),              # vec slab
        ],
        out_specs=pl.BlockSpec((tn, OUT_WIDTH), lambda i: (i, 0)),
        compiler_params=pltpu.CompilerParams(
            dimension_semantics=("parallel",)),
    )(t_in, w_stack, vec_slab)

    out = out[:N]
    y1 = out[:, 0:1]
    y2 = out[:, 1:2]
    y3 = out[:, 2:3]
    k1 = out[:, 3:4]
    k2 = out[:, 4:5]
    k3 = out[:, 5:6]
    return (y1, y2, y3, k1, k2, k3)


# Pure-JAX reference of one (unfused) MLP, for correctness checking.
def _mlp_ref(t, params):
    h = t
    for i, (w, b) in enumerate(params):
        h = h @ w + b
        if i < len(params) - 1:
            h = _gelu_exact(h)
    return h


if __name__ == "__main__":
    root = jax.random.PRNGKey(0)
    k_in, k_net, k_k1, k_k2, k_k3 = jax.random.split(root, 5)

    N = 256  # batch of scalar time points t
    t = jax.random.uniform(k_in, (N, 1), jnp.float32)

    net_params = init_net(k_net, LAYERS)
    k1_params = init_net(k_k1, K_LAYERS)
    k2_params = init_net(k_k2, K_LAYERS)
    k3_params = init_net(k_k3, K_LAYERS)

    packed = pack_params(net_params, k1_params, k2_params, k3_params)

    outs = pitlnn_forward(t, packed)
    outs = jax.block_until_ready(outs)
    y1, y2, y3, k1, k2, k3 = outs

    # Shape / finiteness checks
    for o in outs:
        assert o.shape == (N, 1)
        assert jnp.isfinite(o).all()

    # Numerical check against the unfused pure-JAX reference.
    y_ref = _mlp_ref(t, net_params)
    k1_ref = _mlp_ref(t, k1_params)
    k2_ref = _mlp_ref(t, k2_params)
    k3_ref = _mlp_ref(t, k3_params)
    assert jnp.allclose(y1, y_ref[:, 0:1], atol=1e-5, rtol=1e-5)
    assert jnp.allclose(y2, y_ref[:, 1:2], atol=1e-5, rtol=1e-5)
    assert jnp.allclose(y3, y_ref[:, 2:3], atol=1e-5, rtol=1e-5)
    assert jnp.allclose(k1, k1_ref, atol=1e-5, rtol=1e-5)
    assert jnp.allclose(k2, k2_ref, atol=1e-5, rtol=1e-5)
    assert jnp.allclose(k3, k3_ref, atol=1e-5, rtol=1e-5)

    print("KERNEL_OK")
</pallas_src>

<mosaic_0001>
module attributes {stable_mosaic.version = 11 : i64} {
  func.func @fused_pitlnn_kernel(%arg0: i32, %arg1: memref<256x1xf32, #tpu.memory_space<vmem>>, %arg2: memref<5x128x128xf32, #tpu.memory_space<vmem>>, %arg3: memref<8x128xf32, #tpu.memory_space<vmem>>, %arg4: memref<256x128xf32, #tpu.memory_space<vmem>>) attributes {dimension_semantics = [#tpu.dimension_semantics<parallel>], iteration_bounds = array<i64: 1>, scalar_prefetch = 0 : i64, scratch_operands = 0 : i64, tpu.core_type = #tpu.core_type<tc>, window_params = [{transform_indices = @transform_0, window_bounds = array<i64: 256, 1>}, {pipeline_mode = #tpu.pipeline_mode<synchronous>, transform_indices = @transform_1, window_bounds = array<i64: 5, 128, 128>}, {pipeline_mode = #tpu.pipeline_mode<synchronous>, transform_indices = @transform_2, window_bounds = array<i64: 8, 128>}, {transform_indices = @transform_3, window_bounds = array<i64: 256, 128>}]} {
    %c0 = arith.constant 0 : index
    %c0_0 = arith.constant 0 : index
    %0 = vector.load %arg1[%c0, %c0_0] : memref<256x1xf32, #tpu.memory_space<vmem>>, vector<256x1xf32>
    %c0_1 = arith.constant 0 : index
    %c0_2 = arith.constant 0 : index
    %1 = vector.load %arg3[%c0_1, %c0_2] : memref<8x128xf32, #tpu.memory_space<vmem>>, vector<8x128xf32>
    %2 = vector.extract_strided_slice %1 {offsets = [0, 0], sizes = [1, 128], strides = [1, 1]} : vector<8x128xf32> to vector<1x128xf32>
    %3 = vector.broadcast %0 : vector<256x1xf32> to vector<256x128xf32>
    %4 = vector.broadcast %2 : vector<1x128xf32> to vector<256x128xf32>
    %5 = arith.mulf %3, %4 : vector<256x128xf32>
    %6 = vector.extract_strided_slice %1 {offsets = [1, 0], sizes = [1, 128], strides = [1, 1]} : vector<8x128xf32> to vector<1x128xf32>
    %7 = vector.broadcast %6 : vector<1x128xf32> to vector<256x128xf32>
    %8 = arith.addf %5, %7 : vector<256x128xf32>
    %cst = arith.constant 5.000000e-01 : f32
    %9 = vector.broadcast %cst : f32 to vector<256x128xf32>
    %10 = arith.mulf %9, %8 : vector<256x128xf32>
    %cst_3 = arith.constant 0.707106769 : f32
    %11 = vector.broadcast %cst_3 : f32 to vector<256x128xf32>
    %12 = arith.mulf %8, %11 : vector<256x128xf32>
    %13 = math.erf %12 : vector<256x128xf32>
    %cst_4 = arith.constant 1.000000e+00 : f32
    %14 = vector.broadcast %cst_4 : f32 to vector<256x128xf32>
    %15 = arith.addf %14, %13 : vector<256x128xf32>
    %16 = arith.mulf %10, %15 : vector<256x128xf32>
    %c0_5 = arith.constant 0 : index
    %c0_6 = arith.constant 0 : index
    %c0_7 = arith.constant 0 : index
    %17 = vector.load %arg2[%c0_5, %c0_6, %c0_7] : memref<5x128x128xf32, #tpu.memory_space<vmem>>, vector<1x128x128xf32>
    %18 = vector.shape_cast %17 : vector<1x128x128xf32> to vector<128x128xf32>
    %cst_8 = arith.constant dense<0.000000e+00> : vector<256x128xf32>
    %19 = tpu.matmul %16, %18, %cst_8 {dimension_numbers = #tpu.dot_dimension_numbers<[1], [0], [0], [1], [0, 0, 1, 1], [], []>} : vector<256x128xf32>, vector<128x128xf32>, vector<256x128xf32> -> vector<256x128xf32>
    %20 = vector.extract_strided_slice %1 {offsets = [2, 0], sizes = [1, 128], strides = [1, 1]} : vector<8x128xf32> to vector<1x128xf32>
    %21 = vector.broadcast %20 : vector<1x128xf32> to vector<256x128xf32>
    %22 = arith.addf %19, %21 : vector<256x128xf32>
    %cst_9 = arith.constant 5.000000e-01 : f32
    %23 = vector.broadcast %cst_9 : f32 to vector<256x128xf32>
    %24 = arith.mulf %23, %22 : vector<256x128xf32>
    %cst_10 = arith.constant 0.707106769 : f32
    %25 = vector.broadcast %cst_10 : f32 to vector<256x128xf32>
    %26 = arith.mulf %22, %25 : vector<256x128xf32>
    %27 = math.erf %26 : vector<256x128xf32>
    %cst_11 = arith.constant 1.000000e+00 : f32
    %28 = vector.broadcast %cst_11 : f32 to vector<256x128xf32>
    %29 = arith.addf %28, %27 : vector<256x128xf32>
    %30 = arith.mulf %24, %29 : vector<256x128xf32>
    %c1 = arith.constant 1 : index
    %c0_12 = arith.constant 0 : index
    %c0_13 = arith.constant 0 : index
    %31 = vector.load %arg2[%c1, %c0_12, %c0_13] : memref<5x128x128xf32, #tpu.memory_space<vmem>>, vector<1x128x128xf32>
    %32 = vector.shape_cast %31 : vector<1x128x128xf32> to vector<128x128xf32>
    %cst_14 = arith.constant dense<0.000000e+00> : vector<256x128xf32>
    %33 = tpu.matmul %30, %32, %cst_14 {dimension_numbers = #tpu.dot_dimension_numbers<[1], [0], [0], [1], [0, 0, 1, 1], [], []>} : vector<256x128xf32>, vector<128x128xf32>, vector<256x128xf32> -> vector<256x128xf32>
    %34 = vector.extract_strided_slice %1 {offsets = [3, 0], sizes = [1, 128], strides = [1, 1]} : vector<8x128xf32> to vector<1x128xf32>
    %35 = vector.broadcast %34 : vector<1x128xf32> to vector<256x128xf32>
    %36 = arith.addf %33, %35 : vector<256x128xf32>
    %cst_15 = arith.constant 5.000000e-01 : f32
    %37 = vector.broadcast %cst_15 : f32 to vector<256x128xf32>
    %38 = arith.mulf %37, %36 : vector<256x128xf32>
    %cst_16 = arith.constant 0.707106769 : f32
    %39 = vector.broadcast %cst_16 : f32 to vector<256x128xf32>
    %40 = arith.mulf %36, %39 : vector<256x128xf32>
    %41 = math.erf %40 : vector<256x128xf32>
    %cst_17 = arith.constant 1.000000e+00 : f32
    %42 = vector.broadcast %cst_17 : f32 to vector<256x128xf32>
    %43 = arith.addf %42, %41 : vector<256x128xf32>
    %44 = arith.mulf %38, %43 : vector<256x128xf32>
    %c2 = arith.constant 2 : index
    %c0_18 = arith.constant 0 : index
    %c0_19 = arith.constant 0 : index
    %45 = vector.load %arg2[%c2, %c0_18, %c0_19] : memref<5x128x128xf32, #tpu.memory_space<vmem>>, vector<1x128x128xf32>
    %46 = vector.shape_cast %45 : vector<1x128x128xf32> to vector<128x128xf32>
    %cst_20 = arith.constant dense<0.000000e+00> : vector<256x128xf32>
    %47 = tpu.matmul %44, %46, %cst_20 {dimension_numbers = #tpu.dot_dimension_numbers<[1], [0], [0], [1], [0, 0, 1, 1], [], []>} : vector<256x128xf32>, vector<128x128xf32>, vector<256x128xf32> -> vector<256x128xf32>
    %48 = vector.extract_strided_slice %1 {offsets = [4, 0], sizes = [1, 128], strides = [1, 1]} : vector<8x128xf32> to vector<1x128xf32>
    %49 = vector.broadcast %48 : vector<1x128xf32> to vector<256x128xf32>
    %50 = arith.addf %47, %49 : vector<256x128xf32>
    %cst_21 = arith.constant 5.000000e-01 : f32
    %51 = vector.broadcast %cst_21 : f32 to vector<256x128xf32>
    %52 = arith.mulf %51, %50 : vector<256x128xf32>
    %cst_22 = arith.constant 0.707106769 : f32
    %53 = vector.broadcast %cst_22 : f32 to vector<256x128xf32>
    %54 = arith.mulf %50, %53 : vector<256x128xf32>
    %55 = math.erf %54 : vector<256x128xf32>
    %cst_23 = arith.constant 1.000000e+00 : f32
    %56 = vector.broadcast %cst_23 : f32 to vector<256x128xf32>
    %57 = arith.addf %56, %55 : vector<256x128xf32>
    %58 = arith.mulf %52, %57 : vector<256x128xf32>
    %c3 = arith.constant 3 : index
    %c0_24 = arith.constant 0 : index
    %c0_25 = arith.constant 0 : index
    %59 = vector.load %arg2[%c3, %c0_24, %c0_25] : memref<5x128x128xf32, #tpu.memory_space<vmem>>, vector<1x128x128xf32>
    %60 = vector.shape_cast %59 : vector<1x128x128xf32> to vector<128x128xf32>
    %cst_26 = arith.constant dense<0.000000e+00> : vector<256x128xf32>
    %61 = tpu.matmul %58, %60, %cst_26 {dimension_numbers = #tpu.dot_dimension_numbers<[1], [0], [0], [1], [0, 0, 1, 1], [], []>} : vector<256x128xf32>, vector<128x128xf32>, vector<256x128xf32> -> vector<256x128xf32>
    %62 = vector.extract_strided_slice %1 {offsets = [5, 0], sizes = [1, 128], strides = [1, 1]} : vector<8x128xf32> to vector<1x128xf32>
    %63 = vector.broadcast %62 : vector<1x128xf32> to vector<256x128xf32>
    %64 = arith.addf %61, %63 : vector<256x128xf32>
    %cst_27 = arith.constant 5.000000e-01 : f32
    %65 = vector.broadcast %cst_27 : f32 to vector<256x128xf32>
    %66 = arith.mulf %65, %64 : vector<256x128xf32>
    %cst_28 = arith.constant 0.707106769 : f32
    %67 = vector.broadcast %cst_28 : f32 to vector<256x128xf32>
    %68 = arith.mulf %64, %67 : vector<256x128xf32>
    %69 = math.erf %68 : vector<256x128xf32>
    %cst_29 = arith.constant 1.000000e+00 : f32
    %70 = vector.broadcast %cst_29 : f32 to vector<256x128xf32>
    %71 = arith.addf %70, %69 : vector<256x128xf32>
    %72 = arith.mulf %66, %71 : vector<256x128xf32>
    %c4 = arith.constant 4 : index
    %c0_30 = arith.constant 0 : index
    %c0_31 = arith.constant 0 : index
    %73 = vector.load %arg2[%c4, %c0_30, %c0_31] : memref<5x128x128xf32, #tpu.memory_space<vmem>>, vector<1x128x128xf32>
    %74 = vector.shape_cast %73 : vector<1x128x128xf32> to vector<128x128xf32>
    %cst_32 = arith.constant dense<0.000000e+00> : vector<256x128xf32>
    %75 = tpu.matmul %72, %74, %cst_32 {dimension_numbers = #tpu.dot_dimension_numbers<[1], [0], [0], [1], [0, 0, 1, 1], [], []>} : vector<256x128xf32>, vector<128x128xf32>, vector<256x128xf32> -> vector<256x128xf32>
    %76 = vector.extract_strided_slice %1 {offsets = [6, 0], sizes = [1, 128], strides = [1, 1]} : vector<8x128xf32> to vector<1x128xf32>
    %77 = vector.broadcast %76 : vector<1x128xf32> to vector<256x128xf32>
    %78 = arith.addf %75, %77 : vector<256x128xf32>
    %c0_33 = arith.constant 0 : index
    %c0_34 = arith.constant 0 : index
    %79 = vector.load %arg4[%c0_33, %c0_34] : memref<256x128xf32, #tpu.memory_space<vmem>>, vector<256x128xf32>
    tpu.vector_store %arg4[%c0_33, %c0_34], %78 {strides = array<i32>} : memref<256x128xf32, #tpu.memory_space<vmem>>, vector<256x128xf32>,
    return
  }
  func.func @transform_0(%arg0: i32) -> (i32, i32) {
    %c0_i32 = arith.constant 0 : i32
    %c0_i32_0 = arith.constant 0 : i32
    return %arg0, %c0_i32 : i32, i32
  }
  func.func @transform_1(%arg0: i32) -> (i32, i32, i32) {
    %c0_i32 = arith.constant 0 : i32
    %c0_i32_0 = arith.constant 0 : i32
    %c0_i32_1 = arith.constant 0 : i32
    %c0_i32_2 = arith.constant 0 : i32
    return %c0_i32, %c0_i32_0, %c0_i32_1 : i32, i32, i32
  }
  func.func @transform_2(%arg0: i32) -> (i32, i32) {
    %c0_i32 = arith.constant 0 : i32
    %c0_i32_0 = arith.constant 0 : i32
    %c0_i32_1 = arith.constant 0 : i32
    return %c0_i32, %c0_i32_0 : i32, i32
  }
  func.func @transform_3(%arg0: i32) -> (i32, i32) {
    %c0_i32 = arith.constant 0 : i32
    %c0_i32_0 = arith.constant 0 : i32
    return %arg0, %c0_i32 : i32, i32
  }
}

</mosaic_0001>

<bundles_post_ra>
// kernel: tpu_custom_call.1
= control target key start
LH: loop header
LB: loop body
LE: loop exit
PB: predicated region body
PF: predicated region fallthrough
CT: control target
= control target key end

     0   :  { %8 = vsyncpa [#allocation3], 0  ;;  %s4397_s0 = inlined_call_operand.vmem [shape: f32[256,1], index: 0, kind: input, shape index: {}]   ;;  %s4398_s1 = inlined_call_operand.hbm [shape: f32[5,128,128], index: 1, kind: input, shape index: {}]   ;;  %s4399_s2 = inlined_call_operand.vmem [shape: f32[8,128], index: 2, kind: input, shape index: {}]   ;;  %s4400_s3 = inlined_call_operand.hbm [shape: f32[256,128], index: 3, kind: output, shape index: {}]  }
   0x1   :  { %9 = vsyncpa [#allocation4], 0  ;;  %s3565_s12 = smov [#allocation2]   ;;  %s3517_s16 = scalar_lea.hbm %s4398_s1, 10240 }
   0x2   :  { %s17_s13 = sshll.u32 %s3565_s12, 4  ;;  %p3518_p0 = scmp.ne.s32.totalorder %s4398_s1, %s3517_s16  ;;  %s18_s13 = int_to_ptr.vmem [resolvable:$true] %s17_s13 }
   0x3   :  { %p3521_p1 = scmp.lt.u32.totalorder %s3517_s16, %s4398_s1 }
   0x5   :  { %p3523_p2 = pnand %p3521_p1, %p3518_p0 }
   0x7   :  { %3526 = shalt.err (!%p3523_p2)
}
   0x8   :  { %s3527_s21 = scalar_lea.vmem %s18_s13, 10240  ;;  %p3532_p4 = scmp.lt.s32.totalorder %s18_s13, %s18_s13 }
   0x9   :  { %p3528_p3 = scmp.ne.s32.totalorder %s18_s13, %s3527_s21  ;;  %p3533_p5 = scmp.lt.s32.totalorder %s3527_s21, %s3527_s21 }
   0xb   :  { %p3534_p6 = por %p3533_p5, %p3532_p4 }
   0xd   :  { %p3535_p7 = pnand %p3534_p6, %p3528_p3 }
   0xf   :  { %3538 = shalt.err (!%p3535_p7)
}
  0x10   :  { %s3566_s22 = smov 128   ;;  %s3567_s23 = smov 8  }
  0x11   :  { %23 = dma.hbm_to_vmem [thread:$0]  %s4398_s1, 10240, %s18_s13, [#allocation3], %s3566_s22, %s3566_s22, %s3567_s23  }
  0x12   :  { %3561 = dma.done.wait [#allocation3], 10240  }
  0x13   :  { %3562 = vsyncadd [#allocation3], 4294957056  ;;  %v3568_v0 = vmov 0   ;;  %v31_v1 = vld [vmem:[%s4397_s0 + $0x10] sm:$0xff]  ;;  %v29_v2 = vld [vmem:[%s4397_s0] sm:$0xff]  ;;  %v222_v60 = vlaneseq }
  0x14   :  { %3194 = vset.pattern.permute.xlu1 %v3568_v0  ;;  %3193 = vset.pattern.permute.xlu0 %v3568_v0  ;;  %v32_v3 = vld [vmem:[%s4397_s0 + $0x18] sm:$0xff]  ;;  %v30_v4 = vld [vmem:[%s4397_s0 + $0x8] sm:$0xff]  ;;  %v33_v6 = vld [vmem:[%s4397_s0 + $0x20] sm:$0xff] }
  0x15   :  { %74 = vperm.xlu1 %3194, %v31_v1   ;;  %64 = vperm.xlu0 %3193, %v29_v2   ;;  %v34_v5 = vld [vmem:[%s4397_s0 + $0x28] sm:$0xff]  ;;  %v36_v7 = vld [vmem:[%s4397_s0 + $0x38] sm:$0xff]  ;;  %v35_v8 = vld [vmem:[%s4397_s0 + $0x30] sm:$0xff]  ;;  %v3704_v61 = vshrl.u32 %v222_v60, 7 }
  0x16   :  { %v454_v9 = vld [vmem:[#allocation2] sm:$0xff]  ;;  %v455_v10 = vld [vmem:[#allocation2 + $0x8] sm:$0xff]  ;;  %v456_v11 = vld [vmem:[#allocation2 + $0x10] sm:$0xff] }
  0x17   :  { %v457_v12 = vld [vmem:[#allocation2 + $0x18] sm:$0xff]  ;;  %v3012_v13 = vpack.c.bf16 %v455_v10, %v454_v9  ;;  %v458_v15 = vld [vmem:[#allocation2 + $0x20] sm:$0xff]  ;;  %v459_v16 = vld [vmem:[#allocation2 + $0x28] sm:$0xff]  ;;  %v224_v62 = vsub.s32 0, %v3704_v61  ;;  %v260_v0 = vsub.s32 1, %v3704_v61 }
  0x18   :  { %v3016_v14 = vpack.c.bf16 %v457_v12, %v456_v11  ;;  %v38_v17 = vld [vmem:[%s4397_s0 + $0x48] sm:$0xff]  ;;  %v37_v18 = vld [vmem:[%s4397_s0 + $0x40] sm:$0xff]  ;;  %v3020_v19 = vpack.c.bf16 %v459_v16, %v458_v15  ;;  %v460_v20 = vld [vmem:[#allocation2 + $0x30] sm:$0xff] }
  0x19   :  { %79 = vperm.xlu1 %3194, %v32_v3   ;;  %69 = vperm.xlu0 %3193, %v30_v4   ;;  %v461_v21 = vld [vmem:[#allocation2 + $0x38] sm:$0xff]  ;;  %v40_v22 = vld [vmem:[%s4397_s0 + $0x58] sm:$0xff]  ;;  %v39_v23 = vld [vmem:[%s4397_s0 + $0x50] sm:$0xff] }
  0x1a   :  { %3013 = vmatprep.subr.bf16.mxu0 %v3012_v13  ;;  %3172 = vmatprep.subr.bf16.mxu1 %v3012_v13  ;;  %v3024_v24 = vpack.c.bf16 %v461_v21, %v460_v20  ;;  %v462_v25 = vld [vmem:[#allocation2 + $0x40] sm:$0xff]  ;;  %v463_v26 = vld [vmem:[#allocation2 + $0x48] sm:$0xff]  ;;  %v41_v28 = vld [vmem:[%s4397_s0 + $0x60] sm:$0xff] }
  0x1b   :  { %3015 = vmatpush3.bf16.msra.mxu0 %v3012_v13  ;;  %3180 = vmatpush3.bf16.msra.mxu1 %v3012_v13  ;;  %v42_v27 = vld [vmem:[%s4397_s0 + $0x68] sm:$0xff]  ;;  %v3028_v29 = vpack.c.bf16 %v463_v26, %v462_v25  ;;  %v464_v30 = vld [vmem:[#allocation2 + $0x50] sm:$0xff]  ;;  %v465_v31 = vld [vmem:[#allocation2 + $0x58] sm:$0xff] }
  0x1c   :  { %3017 = vmatprep.subr.bf16.mxu0 %v3016_v14  ;;  %3173 = vmatprep.subr.bf16.mxu1 %v3016_v14  ;;  %v44_v32 = vld [vmem:[%s4397_s0 + $0x78] sm:$0xff]  ;;  %v43_v33 = vld [vmem:[%s4397_s0 + $0x70] sm:$0xff]  ;;  %v3032_v34 = vpack.c.bf16 %v465_v31, %v464_v30  ;;  %v466_v35 = vld [vmem:[#allocation2 + $0x60] sm:$0xff] }
  0x1d   :  { %89 = vperm.xlu1 %3194, %v34_v5   ;;  %84 = vperm.xlu0 %3193, %v33_v6   ;;  %v467_v36 = vld [vmem:[#allocation2 + $0x68] sm:$0xff]  ;;  %v46_v37 = vld [vmem:[%s4397_s0 + $0x88] sm:$0xff]  ;;  %v45_v38 = vld [vmem:[%s4397_s0 + $0x80] sm:$0xff] }
  0x1e   :  { %v3036_v39 = vpack.c.bf16 %v467_v36, %v466_v35  ;;  %v468_v40 = vld [vmem:[#allocation2 + $0x70] sm:$0xff]  ;;  %v469_v41 = vld [vmem:[#allocation2 + $0x78] sm:$0xff]  ;;  %v47_v43 = vld [vmem:[%s4397_s0 + $0x90] sm:$0xff] }
  0x1f   :  { %3019 = vmatpush3.bf16.msra.mxu0 %v3016_v14  ;;  %3181 = vmatpush3.bf16.msra.mxu1 %v3016_v14  ;;  %v48_v42 = vld [vmem:[%s4397_s0 + $0x98] sm:$0xff]  ;;  %v3040_v44 = vpack.c.bf16 %v469_v41, %v468_v40  ;;  %v50_v45 = vld [vmem:[%s4397_s0 + $0xa8] sm:$0xff]  ;;  %v49_v46 = vld [vmem:[%s4397_s0 + $0xa0] sm:$0xff] }
  0x20   :  { %3021 = vmatprep.subr.bf16.mxu0 %v3020_v19  ;;  %3174 = vmatprep.subr.bf16.mxu1 %v3020_v19  ;;  %v52_v47 = vld [vmem:[%s4397_s0 + $0xb8] sm:$0xff]  ;;  %v51_v48 = vld [vmem:[%s4397_s0 + $0xb0] sm:$0xff]  ;;  %v54_v49 = vld [vmem:[%s4397_s0 + $0xc8] sm:$0xff] }
  0x21   :  { %99 = vperm.xlu1 %3194, %v36_v7   ;;  %94 = vperm.xlu0 %3193, %v35_v8   ;;  %v53_v50 = vld [vmem:[%s4397_s0 + $0xc0] sm:$0xff]  ;;  %v56_v51 = vld [vmem:[%s4397_s0 + $0xd8] sm:$0xff]  ;;  %v55_v52 = vld [vmem:[%s4397_s0 + $0xd0] sm:$0xff] }
  0x22   :  { %v58_v53 = vld [vmem:[%s4397_s0 + $0xe8] sm:$0xff]  ;;  %v57_v54 = vld [vmem:[%s4397_s0 + $0xe0] sm:$0xff]  ;;  %v60_v55 = vld [vmem:[%s4397_s0 + $0xf8] sm:$0xff] }
  0x23   :  { %3023 = vmatpush3.bf16.msra.mxu0 %v3020_v19  ;;  %3182 = vmatpush3.bf16.msra.mxu1 %v3020_v19  ;;  %v59_v56 = vld [vmem:[%s4397_s0 + $0xf0] sm:$0xff]  ;;  %v860_v57 = vld [vmem:[#allocation2 + $0x80] sm:$0xff]  ;;  %v3710_v63 = vld [vmem:[%s4399_s2] sm:$0xff] }
  0x24   :  { %3025 = vmatprep.subr.bf16.mxu0 %v3024_v24  ;;  %3175 = vmatprep.subr.bf16.mxu1 %v3024_v24  ;;  %v861_v58 = vld [vmem:[#allocation2 + $0x88] sm:$0xff]  ;;  %v3714_v1 = vrot.slane %v3710_v63, %v224_v62  ;;  %v3717_v2 = vrot.slane %v3710_v63, %v260_v0 }
  0x25   :  { %109 = vperm.xlu1 %3194, %v38_v17   ;;  %104 = vperm.xlu0 %3193, %v37_v18   ;;  %v3701_v59 = vpack.c.bf16 %v861_v58, %v860_v57 }
  0x27   :  { %3027 = vmatpush3.bf16.msra.mxu0 %v3024_v24  ;;  %3183 = vmatpush3.bf16.msra.mxu1 %v3024_v24 }
  0x28   :  { %3029 = vmatprep.subr.bf16.mxu0 %v3028_v29  ;;  %3176 = vmatprep.subr.bf16.mxu1 %v3028_v29 }
  0x29   :  { %119 = vperm.xlu1 %3194, %v40_v22   ;;  %114 = vperm.xlu0 %3193, %v39_v23  }
  0x2b   :  { %3031 = vmatpush3.bf16.msra.mxu0 %v3028_v29  ;;  %3184 = vmatpush3.bf16.msra.mxu1 %v3028_v29 }
  0x2c   :  { %3033 = vmatprep.subr.bf16.mxu0 %v3032_v34  ;;  %3177 = vmatprep.subr.bf16.mxu1 %v3032_v34 }
  0x2d   :  { %129 = vperm.xlu1 %3194, %v42_v27   ;;  %124 = vperm.xlu0 %3193, %v41_v28  }
  0x2f   :  { %3035 = vmatpush3.bf16.msra.mxu0 %v3032_v34  ;;  %3185 = vmatpush3.bf16.msra.mxu1 %v3032_v34 }
  0x30   :  { %3037 = vmatprep.subr.bf16.mxu0 %v3036_v39  ;;  %3178 = vmatprep.subr.bf16.mxu1 %v3036_v39 }
  0x31   :  { %139 = vperm.xlu1 %3194, %v44_v32   ;;  %134 = vperm.xlu0 %3193, %v43_v33  }
  0x33   :  { %3039 = vmatpush3.bf16.msra.mxu0 %v3036_v39  ;;  %3186 = vmatpush3.bf16.msra.mxu1 %v3036_v39 }
  0x34   :  { %3041 = vmatprep.subr.bf16.mxu0 %v3040_v44  ;;  %3179 = vmatprep.subr.bf16.mxu1 %v3040_v44 }
  0x35   :  { %149 = vperm.xlu1 %3194, %v46_v37   ;;  %144 = vperm.xlu0 %3193, %v45_v38  }
  0x37   :  { %3043 = vmatpush3.bf16.msra.mxu0 %v3040_v44  ;;  %3187 = vmatpush3.bf16.msra.mxu1 %v3040_v44 }
  0x38   :  { %3045 = vmatprep.subr.bf16.mxu1 %v3701_v59 }
  0x39   :  { %159 = vperm.xlu1 %3194, %v48_v42   ;;  %154 = vperm.xlu0 %3193, %v47_v43  }
  0x3d   :  { %169 = vperm.xlu1 %3194, %v50_v45   ;;  %164 = vperm.xlu0 %3193, %v49_v46  }
  0x41   :  { %179 = vperm.xlu1 %3194, %v52_v47   ;;  %174 = vperm.xlu0 %3193, %v51_v48  }
  0x45   :  { %189 = vperm.xlu1 %3194, %v54_v49   ;;  %184 = vperm.xlu0 %3193, %v53_v50  }
  0x49   :  { %199 = vperm.xlu1 %3194, %v56_v51   ;;  %194 = vperm.xlu0 %3193, %v55_v52  }
  0x4d   :  { %209 = vperm.xlu1 %3194, %v58_v53   ;;  %204 = vperm.xlu0 %3193, %v57_v54  }
  0x51   :  { %219 = vperm.xlu1 %3194, %v60_v55   ;;  %214 = vperm.xlu0 %3193, %v59_v56  }
  0x94   :  { %v75_v3 = vpop.permute.xlu1 %74  ;;  %v65_v4 = vpop.permute.xlu0 %64 }
  0x95   :  { %v228_v5 = vmul.f32 %v3714_v1, %v75_v3  ;;  %v226_v6 = vmul.f32 %v3714_v1, %v65_v4 }
  0x97   :  { %v264_v7 = vadd.f32 %v3717_v2, %v228_v5  ;;  %v262_v8 = vadd.f32 %v3717_v2, %v226_v6 }
  0x98   :  { %v80_v9 = vpop.permute.xlu1 %79  ;;  %v70_v10 = vpop.permute.xlu0 %69 }
  0x99   :  { %v328_v11 = vmul.f32 0.70710677, %v264_v7  ;;  %v326_v12 = vmul.f32 0.70710677, %v262_v8  ;;  %v229_v13 = vmul.f32 %v3714_v1, %v80_v9  ;;  %v227_v14 = vmul.f32 %v3714_v1, %v70_v10 }
  0x9a   :  { %v294_v46 = vmul.f32 0.5, %v262_v8  ;;  %v296_v57 = vmul.f32 0.5, %v264_v7 }
  0x9b   :  { %3195 = verf.f32 %v328_v11  ;;  %v3726_v15 = vadd.f32 %v3717_v2, %v229_v13  ;;  %v263_v16 = vadd.f32 %v3717_v2, %v227_v14 }
  0x9c   :  { %v90_v17 = vpop.permute.xlu1 %89  ;;  %v85_v18 = vpop.permute.xlu0 %84  ;;  %3197 = verf.f32 %v326_v12 }
  0x9d   :  { %v329_v19 = vmul.f32 0.70710677, %v3726_v15  ;;  %v231_v20 = vmul.f32 %v3714_v1, %v90_v17  ;;  %v230_v21 = vmul.f32 %v3714_v1, %v85_v18  ;;  %v327_v22 = vmul.f32 0.70710677, %v263_v16 }
  0x9e   :  { %v295_v55 = vmul.f32 0.5, %v263_v16  ;;  %v297_v12 = vmul.f32 0.5, %v3726_v15 }
  0x9f   :  { %3199 = verf.f32 %v329_v19  ;;  %v3733_v23 = vadd.f32 %v3717_v2, %v231_v20  ;;  %v266_v24 = vadd.f32 %v3717_v2, %v230_v21 }
  0xa0   :  { %3201 = verf.f32 %v327_v22  ;;  %v100_v25 = vpop.permute.xlu1 %99  ;;  %v95_v26 = vpop.permute.xlu0 %94 }
  0xa1   :  { %v331_v27 = vmul.f32 0.70710677, %v3733_v23  ;;  %v330_v28 = vmul.f32 0.70710677, %v266_v24  ;;  %v233_v29 = vmul.f32 %v3714_v1, %v100_v25  ;;  %v232_v30 = vmul.f32 %v3714_v1, %v95_v26 }
  0xa2   :  { %v298_v17 = vmul.f32 0.5, %v266_v24  ;;  %v299_v24 = vmul.f32 0.5, %v3733_v23 }
  0xa3   :  { %3203 = verf.f32 %v331_v27  ;;  %v3740_v31 = vadd.f32 %v3717_v2, %v233_v29  ;;  %v3743_v32 = vadd.f32 %v3717_v2, %v232_v30 }
  0xa4   :  { %3205 = verf.f32 %v330_v28  ;;  %v110_v33 = vpop.permute.xlu1 %109  ;;  %v105_v34 = vpop.permute.xlu0 %104 }
  0xa5   :  { %v3196_v35 = vpop.eup %3195  ;;  %v235_v36 = vmul.f32 %v3714_v1, %v110_v33  ;;  %v234_v37 = vmul.f32 %v3714_v1, %v105_v34  ;;  %v333_v39 = vmul.f32 0.70710677, %v3740_v31  ;;  %v332_v40 = vmul.f32 0.70710677, %v3743_v32 }
  0xa6   :  { %v3198_v38 = vpop.eup %3197  ;;  %v392_v49 = vadd.f32 1.0, %v3196_v35 }
  0xa7   :  { %v3750_v41 = vadd.f32 %v3717_v2, %v235_v36  ;;  %v3753_v42 = vadd.f32 %v3717_v2, %v234_v37  ;;  %v390_v43 = vadd.f32 1.0, %v3198_v38  ;;  %3207 = verf.f32 %v333_v39 }
  0xa8   :  { %v120_v44 = vpop.permute.xlu1 %119  ;;  %v115_v45 = vpop.permute.xlu0 %114  ;;  %3209 = verf.f32 %v332_v40  ;;  %v424_v11 = vmul.f32 %v392_v49, %v296_v57  ;;  %v300_v39 = vmul.f32 0.5, %v3743_v32 }
  0xa9   :  { %v3200_v47 = vpop.eup %3199  ;;  %v335_v48 = vmul.f32 0.70710677, %v3750_v41  ;;  %v334_v51 = vmul.f32 0.70710677, %v3753_v42  ;;  %v237_v52 = vmul.f32 %v3714_v1, %v120_v44  ;;  %v236_v53 = vmul.f32 %v3714_v1, %v115_v45 }
  0xaa   :  { %v3202_v50 = vpop.eup %3201  ;;  %v422_v54 = vmul.f32 %v390_v43, %v294_v46  ;;  %v393_v8 = vadd.f32 1.0, %v3200_v47  ;;  %v301_v45 = vmul.f32 0.5, %v3740_v31 }
  0xab   :  { %3211 = verf.f32 %v335_v48  ;;  %v391_v56 = vadd.f32 1.0, %v3202_v50  ;;  %v3760_v58 = vadd.f32 %v3717_v2, %v237_v52  ;;  %v3763_v60 = vadd.f32 %v3717_v2, %v236_v53 }
  0xac   :  { %3213 = verf.f32 %v334_v51  ;;  %2644 = vmatprep.mubr.f32.mxu0 %v422_v54  ;;  %v130_v62 = vpop.permute.xlu1 %129  ;;  %v125_v0 = vpop.permute.xlu0 %124  ;;  %v425_v21 = vmul.f32 %v393_v8, %v297_v12  ;;  %v302_v51 = vmul.f32 0.5, %v3753_v42  ;;  %v303_v42 = vmul.f32 0.5, %v3750_v41 }
  0xad   :  { %v3204_v3 = vpop.eup %3203  ;;  %v239_v4 = vmul.f32 %v3714_v1, %v130_v62  ;;  %v238_v5 = vmul.f32 %v3714_v1, %v125_v0  ;;  %v423_v6 = vmul.f32 %v391_v56, %v295_v55  ;;  %v337_v7 = vmul.f32 0.70710677, %v3760_v58 }
  0xae   :  { %v3206_v9 = vpop.eup %3205  ;;  %v336_v10 = vmul.f32 0.70710677, %v3763_v60  ;;  %v395_v22 = vadd.f32 1.0, %v3204_v3 }
  0xaf   :  { %v3771_v13 = vadd.f32 %v3717_v2, %v239_v4  ;;  %v3774_v14 = vadd.f32 %v3717_v2, %v238_v5  ;;  %2645 = vmatmul.mubr.f32.vlgmr.msra.gmra.mrb[0].mxu0 %v423_v6  ;;  %v394_v16 = vadd.f32 1.0, %v3206_v9  ;;  %3215 = verf.f32 %v337_v7 }
  0xb0   :  { %2647 = vmatprep.mubr.f32.mxu0 %v424_v11  ;;  %v140_v18 = vpop.permute.xlu1 %139  ;;  %v135_v19 = vpop.permute.xlu0 %134  ;;  %3217 = verf.f32 %v336_v10  ;;  %v427_v43 = vmul.f32 %v395_v22, %v299_v24  ;;  %v304_v5 = vmul.f32 0.5, %v3763_v60 }
  0xb1   :  { %v339_v20 = vmul.f32 0.70710677, %v3771_v13  ;;  %v3208_v25 = vpop.eup %3207  ;;  %v338_v15 = vmul.f32 0.70710677, %v3774_v14  ;;  %v241_v26 = vmul.f32 %v3714_v1, %v140_v18  ;;  %v240_v27 = vmul.f32 %v3714_v1, %v135_v19 }
  0xb2   :  { %v426_v28 = vmul.f32 %v394_v16, %v298_v17  ;;  %v3210_v29 = vpop.eup %3209  ;;  %v397_v30 = vadd.f32 1.0, %v3208_v25  ;;  %v305_v18 = vmul.f32 0.5, %v3760_v58 }
  0xb3   :  { %3219 = verf.f32 %v339_v20  ;;  %2648 = vmatmul.mubr.f32.gmra.mrb[2].mxu0 %v425_v21  ;;  %v3782_v33 = vadd.f32 %v3717_v2, %v241_v26  ;;  %v3785_v34 = vadd.f32 %v3717_v2, %v240_v27  ;;  %v396_v37 = vadd.f32 1.0, %v3210_v29 }
  0xb4   :  { %3221 = verf.f32 %v338_v15  ;;  %2650 = vmatprep.mubr.f32.mxu0 %v426_v28  ;;  %v150_v35 = vpop.permute.xlu1 %149  ;;  %v145_v36 = vpop.permute.xlu0 %144  ;;  %v429_v54 = vmul.f32 %v397_v30, %v301_v45  ;;  %v306_v26 = vmul.f32 0.5, %v3774_v14  ;;  %v307_v14 = vmul.f32 0.5, %v3771_v13 }
  0xb5   :  { %v3212_v38 = vpop.eup %3211  ;;  %v243_v40 = vmul.f32 %v3714_v1, %v150_v35  ;;  %v242_v23 = vmul.f32 %v3714_v1, %v145_v36  ;;  %v341_v46 = vmul.f32 0.70710677, %v3782_v33  ;;  %v340_v47 = vmul.f32 0.70710677, %v3785_v34 }
  0xb6   :  { %v3214_v44 = vpop.eup %3213  ;;  %v428_v32 = vmul.f32 %v396_v37, %v300_v39  ;;  %v399_v56 = vadd.f32 1.0, %v3212_v38 }
  0xb7   :  { %v3794_v48 = vadd.f32 %v3717_v2, %v243_v40  ;;  %v3797_v49 = vadd.f32 %v3717_v2, %v242_v23  ;;  %2651 = vmatmul.mubr.f32.gmra.mrb[4].mxu0 %v427_v43  ;;  %v398_v50 = vadd.f32 1.0, %v3214_v44  ;;  %3223 = verf.f32 %v341_v46 }
  0xb8   :  { %v160_v52 = vpop.permute.xlu1 %159  ;;  %v155_v53 = vpop.permute.xlu0 %154  ;;  %3225 = verf.f32 %v340_v47  ;;  %2653 = vmatprep.mubr.f32.mxu0 %v428_v32  ;;  %v431_v16 = vmul.f32 %v399_v56, %v303_v42  ;;  %v308_v40 = vmul.f32 0.5, %v3785_v34 }
  0xb9   :  { %v343_v31 = vmul.f32 0.70710677, %v3794_v48  ;;  %v342_v55 = vmul.f32 0.70710677, %v3797_v49  ;;  %v3216_v57 = vpop.eup %3215  ;;  %v245_v62 = vmul.f32 %v3714_v1, %v160_v52  ;;  %v244_v0 = vmul.f32 %v3714_v1, %v155_v53  ;;  %v863_v52 = vld [vmem:[#allocation2 + $0x98] sm:$0xff] }
  0xba   :  { %v430_v3 = vmul.f32 %v398_v50, %v302_v51  ;;  %v3218_v4 = vpop.eup %3217  ;;  %v401_v60 = vadd.f32 1.0, %v3216_v57  ;;  %v862_v51 = vld [vmem:[#allocation2 + $0x90] sm:$0xff]  ;;  %v310_v42 = vmul.f32 0.5, %v3797_v49 }
  0xbb   :  { %3227 = verf.f32 %v343_v31  ;;  %2654 = vmatmul.mubr.f32.gmra.mrb[6].mxu0 %v429_v54  ;;  %v3807_v6 = vadd.f32 %v3717_v2, %v245_v62  ;;  %v3810_v8 = vadd.f32 %v3717_v2, %v244_v0  ;;  %v400_v10 = vadd.f32 1.0, %v3218_v4 }
  0xbc   :  { %2656 = vmatprep.mubr.f32.mxu0 %v430_v3  ;;  %v170_v9 = vpop.permute.xlu1 %169  ;;  %v165_v7 = vpop.permute.xlu0 %164  ;;  %3229 = verf.f32 %v342_v55  ;;  %v433_v29 = vmul.f32 %v401_v60, %v305_v18  ;;  %v309_v54 = vmul.f32 0.5, %v3782_v33  ;;  %v3048_v33 = vpack.c.bf16 %v863_v52, %v862_v51 }
  0xbd   :  { %v3220_v11 = vpop.eup %3219  ;;  %v247_v12 = vmul.f32 %v3714_v1, %v170_v9  ;;  %v246_v41 = vmul.f32 %v3714_v1, %v165_v7  ;;  %v345_v19 = vmul.f32 0.70710677, %v3807_v6  ;;  %v344_v20 = vmul.f32 0.70710677, %v3810_v8 }
  0xbe   :  { %v3222_v17 = vpop.eup %3221  ;;  %v432_v25 = vmul.f32 %v400_v10, %v304_v5  ;;  %v403_v24 = vadd.f32 1.0, %v3220_v11  ;;  %v311_v9 = vmul.f32 0.5, %v3794_v48  ;;  %v313_v49 = vmul.f32 0.5, %v3807_v6 }
  0xbf   :  { %v3818_v21 = vadd.f32 %v3717_v2, %v247_v12  ;;  %v3821_v22 = vadd.f32 %v3717_v2, %v246_v41  ;;  %2657 = vmatmul.mubr.f32.gmra.mrb[8].mxu0 %v431_v16  ;;  %v402_v15 = vadd.f32 1.0, %v3222_v17  ;;  %3231 = verf.f32 %v345_v19 }
  0xc0   :  { %v180_v27 = vpop.permute.xlu1 %179  ;;  %v175_v28 = vpop.permute.xlu0 %174  ;;  %3233 = verf.f32 %v344_v20  ;;  %2659 = vmatprep.mubr.f32.mxu0 %v432_v25  ;;  %v435_v50 = vmul.f32 %v403_v24, %v307_v14  ;;  %v865_v24 = vld [vmem:[#allocation2 + $0xa8] sm:$0xff] }
  0xc1   :  { %v347_v58 = vmul.f32 0.70710677, %v3818_v21  ;;  %v3224_v30 = vpop.eup %3223  ;;  %v346_v35 = vmul.f32 0.70710677, %v3821_v22  ;;  %v249_v36 = vmul.f32 %v3714_v1, %v180_v27  ;;  %v248_v37 = vmul.f32 %v3714_v1, %v175_v28 }
  0xc2   :  { %v434_v38 = vmul.f32 %v402_v15, %v306_v26  ;;  %v3226_v39 = vpop.eup %3225  ;;  %v405_v34 = vadd.f32 1.0, %v3224_v30  ;;  %v312_v28 = vmul.f32 0.5, %v3810_v8 }
  0xc3   :  { %3235 = verf.f32 %v347_v58  ;;  %2660 = vmatmul.mubr.f32.gmra.mrb[10].mxu0 %v433_v29  ;;  %v3831_v23 = vadd.f32 %v3717_v2, %v249_v36  ;;  %v3834_v43 = vadd.f32 %v3717_v2, %v248_v37  ;;  %v404_v46 = vadd.f32 1.0, %v3226_v39  ;;  %v864_v29 = vld [vmem:[#allocation2 + $0xa0] sm:$0xff] }
  0xc4   :  { %3237 = verf.f32 %v346_v35  ;;  %2662 = vmatprep.mubr.f32.mxu0 %v434_v38  ;;  %v190_v44 = vpop.permute.xlu1 %189  ;;  %v185_v45 = vpop.permute.xlu0 %184  ;;  %v437_v10 = vmul.f32 %v405_v34, %v309_v54 }
  0xc5   :  { %v3228_v47 = vpop.eup %3227  ;;  %v251_v32 = vmul.f32 %v3714_v1, %v190_v44  ;;  %v250_v13 = vmul.f32 %v3714_v1, %v185_v45  ;;  %v349_v31 = vmul.f32 0.70710677, %v3831_v23  ;;  %v348_v55 = vmul.f32 0.70710677, %v3834_v43 }
  0xc6   :  { %v3230_v53 = vpop.eup %3229  ;;  %v436_v62 = vmul.f32 %v404_v46, %v308_v40  ;;  %v407_v5 = vadd.f32 1.0, %v3228_v47  ;;  %v314_v40 = vmul.f32 0.5, %v3821_v22  ;;  %v3052_v47 = vpack.c.bf16 %v865_v24, %v864_v29 }
  0xc7   :  { %v3842_v56 = vadd.f32 %v3717_v2, %v251_v32  ;;  %v3845_v57 = vadd.f32 %v3717_v2, %v250_v13  ;;  %2663 = vmatmul.mubr.f32.gmra.mrb[12].mxu0 %v435_v50  ;;  %v406_v0 = vadd.f32 1.0, %v3230_v53  ;;  %3239 = verf.f32 %v349_v31 }
  0xc8   :  { %v200_v3 = vpop.permute.xlu1 %199  ;;  %v195_v4 = vpop.permute.xlu0 %194  ;;  %3241 = verf.f32 %v348_v55  ;;  %2665 = vmatprep.mubr.f32.mxu0 %v436_v62  ;;  %v439_v18 = vmul.f32 %v407_v5, %v311_v9  ;;  %v315_v32 = vmul.f32 0.5, %v3818_v21  ;;  %v317_v53 = vmul.f32 0.5, %v3831_v23 }
  0xc9   :  { %v351_v7 = vmul.f32 0.70710677, %v3842_v56  ;;  %v3232_v11 = vpop.eup %3231  ;;  %v350_v12 = vmul.f32 0.70710677, %v3845_v57  ;;  %v253_v41 = vmul.f32 %v3714_v1, %v200_v3  ;;  %v252_v16 = vmul.f32 %v3714_v1, %v195_v4 }
  0xca   :  { %v438_v60 = vmul.f32 %v406_v0, %v310_v42  ;;  %v3234_v17 = vpop.eup %3233  ;;  %v409_v48 = vadd.f32 1.0, %v3232_v11  ;;  %v316_v3 = vmul.f32 0.5, %v3834_v43  ;;  %v318_v5 = vmul.f32 0.5, %v3845_v57 }
  0xcb   :  { %3243 = verf.f32 %v351_v7  ;;  %2666 = vmatmul.mubr.f32.gmra.mrb[14].mxu0 %v437_v10  ;;  %v3855_v19 = vadd.f32 %v3717_v2, %v253_v41  ;;  %v3858_v20 = vadd.f32 %v3717_v2, %v252_v16  ;;  %v408_v26 = vadd.f32 1.0, %v3234_v17 }
  0xcc   :  { %3245 = verf.f32 %v350_v12  ;;  %2668 = vmatprep.mubr.f32.mxu1 %v438_v60  ;;  %v210_v25 = vpop.permute.xlu1 %209  ;;  %v205_v15 = vpop.permute.xlu0 %204  ;;  %v441_v37 = vmul.f32 %v409_v48, %v313_v49  ;;  %v319_v10 = vmul.f32 0.5, %v3842_v56 }
  0xcd   :  { %v3236_v27 = vpop.eup %3235  ;;  %2669 = vmatmul.mubr.f32.vlgmr.msra.gmra.mrb[0].mxu1 %v439_v18  ;;  %v255_v6 = vmul.f32 %v3714_v1, %v210_v25  ;;  %v254_v58 = vmul.f32 %v3714_v1, %v205_v15  ;;  %v353_v35 = vmul.f32 0.70710677, %v3855_v19  ;;  %v352_v36 = vmul.f32 0.70710677, %v3858_v20 }
  0xce   :  { %v3238_v30 = vpop.eup %3237  ;;  %3047 = vmatpush3.bf16.msra.mxu1 %v3701_v59  ;;  %v440_v39 = vmul.f32 %v408_v26, %v312_v28  ;;  %v411_v46 = vadd.f32 1.0, %v3236_v27  ;;  %v321_v16 = vmul.f32 0.5, %v3855_v19  ;;  %v320_v57 = vmul.f32 0.5, %v3858_v20 }
  0xcf   :  { %v3867_v38 = vadd.f32 %v3717_v2, %v255_v6  ;;  %v3870_v8 = vadd.f32 %v3717_v2, %v254_v58  ;;  %v410_v14 = vadd.f32 1.0, %v3238_v30  ;;  %3049 = vmatprep.subr.bf16.mxu1 %v3048_v33  ;;  %3247 = verf.f32 %v353_v35 }
  0xd0   :  { %v220_v44 = vpop.permute.xlu1 %219  ;;  %v215_v45 = vpop.permute.xlu0 %214  ;;  %3249 = verf.f32 %v352_v36  ;;  %2671 = vmatprep.mubr.f32.mxu1 %v440_v39  ;;  %v443_v54 = vmul.f32 %v411_v46, %v315_v32  ;;  %v866_v36 = vld [vmem:[#allocation2 + $0xb0] sm:$0xff]  ;;  %v869_v39 = vld [vmem:[#allocation2 + $0xc8] sm:$0xff]  ;;  %v872_v46 = vld [vmem:[#allocation2 + $0xe0] sm:$0xff] }
  0xd1   :  { %v355_v59 = vmul.f32 0.70710677, %v3867_v38  ;;  %v3240_v13 = vpop.eup %3239  ;;  %v354_v50 = vmul.f32 0.70710677, %v3870_v8  ;;  %2672 = vmatmul.mubr.f32.gmra.mrb[2].mxu1 %v441_v37  ;;  %v257_v34 = vmul.f32 %v3714_v1, %v220_v44  ;;  %v256_v51 = vmul.f32 %v3714_v1, %v215_v45  ;;  %v867_v37 = vld [vmem:[#allocation2 + $0xb8] sm:$0xff] }
  0xd2   :  { %v442_v22 = vmul.f32 %v410_v14, %v314_v40  ;;  %v3242_v52 = vpop.eup %3241  ;;  %v413_v31 = vadd.f32 1.0, %v3240_v13  ;;  %3051 = vmatpush3.bf16.msra.mxu1 %v3048_v33  ;;  %v322_v25 = vmul.f32 0.5, %v3870_v8  ;;  %v323_v26 = vmul.f32 0.5, %v3867_v38  ;;  %v868_v38 = vld [vmem:[#allocation2 + $0xc0] sm:$0xff]  ;;  %v870_v40 = vld [vmem:[#allocation2 + $0xd0] sm:$0xff]  ;;  %v871_v44 = vld [vmem:[#allocation2 + $0xd8] sm:$0xff] }
  0xd3   :  { %3251 = verf.f32 %v355_v59  ;;  %v293_v21 = vadd.f32 %v3717_v2, %v257_v34  ;;  %v292_v55 = vadd.f32 %v3717_v2, %v256_v51  ;;  %v412_v62 = vadd.f32 1.0, %v3242_v52  ;;  %3053 = vmatprep.subr.bf16.mxu1 %v3052_v47  ;;  %v874_v59 = vld [vmem:[#allocation2 + $0xf0] sm:$0xff]  ;;  %v875_v13 = vld [vmem:[#allocation2 + $0xf8] sm:$0xff]  ;;  %v1266_v34 = vld [vmem:[#allocation2 + $0x100] sm:$0xff] }
  0xd4   :  { %3253 = verf.f32 %v354_v50  ;;  %2674 = vmatprep.mubr.f32.mxu1 %v442_v22  ;;  %v445_v23 = vmul.f32 %v413_v31, %v317_v53  ;;  %v3056_v8 = vpack.c.bf16 %v867_v37, %v866_v36  ;;  %v3060_v14 = vpack.c.bf16 %v869_v39, %v868_v38  ;;  %v1267_v51 = vld [vmem:[#allocation2 + $0x108] sm:$0xff]  ;;  %v1268_v22 = vld [vmem:[#allocation2 + $0x110] sm:$0xff]  ;;  %v1269_v53 = vld [vmem:[#allocation2 + $0x118] sm:$0xff] }
  0xd5   :  { %v3244_v0 = vpop.eup %3243  ;;  %v357_v4 = vmul.f32 0.70710677, %v293_v21  ;;  %v356_v42 = vmul.f32 0.70710677, %v292_v55  ;;  %2675 = vmatmul.mubr.f32.gmra.mrb[4].mxu1 %v443_v54  ;;  %v444_v9 = vmul.f32 %v412_v62, %v316_v3  ;;  %v325_v58 = vmul.f32 0.5, %v293_v21  ;;  %v1270_v31 = vld [vmem:[#allocation2 + $0x120] sm:$0xff] }
  0xd6   :  { %v3246_v1 = vpop.eup %3245  ;;  %v415_v7 = vadd.f32 1.0, %v3244_v0  ;;  %3055 = vmatpush3.bf16.msra.mxu1 %v3052_v47  ;;  %v324_v29 = vmul.f32 0.5, %v292_v55  ;;  %v3064_v45 = vpack.c.bf16 %v871_v44, %v870_v40  ;;  %v873_v47 = vld [vmem:[#allocation2 + $0xe8] sm:$0xff]  ;;  %v3072_v50 = vpack.c.bf16 %v875_v13, %v874_v59 }
  0xd7   :  { %v414_v33 = vadd.f32 1.0, %v3246_v1  ;;  %3255 = verf.f32 %v357_v4  ;;  %2677 = vmatprep.mubr.f32.mxu1 %v444_v9  ;;  %3057 = vmatprep.subr.bf16.mxu1 %v3056_v8  ;;  %v3068_v32 = vpack.c.bf16 %v873_v47, %v872_v46  ;;  %v3076_v52 = vpack.c.bf16 %v1267_v51, %v1266_v34  ;;  %v1271_v21 = vld [vmem:[#allocation2 + $0x128] sm:$0xff] }
  0xd8   :  { %3257 = verf.f32 %v356_v42  ;;  %v447_v43 = vmul.f32 %v415_v7, %v319_v10  ;;  %v3080_v54 = vpack.c.bf16 %v1269_v53, %v1268_v22  ;;  %v3084_v55 = vpack.c.bf16 %v1271_v21, %v1270_v31 }
  0xd9   :  { %v446_v2 = vmul.f32 %v414_v33, %v318_v5  ;;  %v3248_v11 = vpop.eup %3247  ;;  %2678 = vmatmul.mubr.f32.gmra.mrb[6].mxu1 %v445_v23  ;;  %3077 = vmatprep.subr.bf16.mxu0 %v3076_v52  ;;  %v472_v62 = vsub.s32 2, %v3704_v61 }
  0xda   :  { %v3250_v12 = vpop.eup %3249  ;;  %v417_v41 = vadd.f32 1.0, %v3248_v11  ;;  %3059 = vmatpush3.bf16.msra.mxu1 %v3056_v8  ;;  %3079 = vmatpush3.bf16.msra.mxu0 %v3076_v52 }
  0xdb   :  { %2680 = vmatprep.mubr.f32.mxu1 %v446_v2  ;;  %v416_v60 = vadd.f32 1.0, %v3250_v12  ;;  %3061 = vmatprep.subr.bf16.mxu1 %v3060_v14  ;;  %v3890_v0 = vrot.slane %v3710_v63, %v472_v62 }
  0xdc   :  { %v449_v56 = vmul.f32 %v417_v41, %v321_v16  ;;  %3081 = vmatprep.subr.bf16.mxu0 %v3080_v54 }
  0xdd   :  { %v3252_v17 = vpop.eup %3251  ;;  %2681 = vmatmul.mubr.f32.gmra.mrb[8].mxu1 %v447_v43  ;;  %v448_v18 = vmul.f32 %v416_v60, %v320_v57 }
  0xde   :  { %v3254_v49 = vpop.eup %3253  ;;  %v419_v48 = vadd.f32 1.0, %v3252_v17  ;;  %3063 = vmatpush3.bf16.msra.mxu1 %v3060_v14  ;;  %3083 = vmatpush3.bf16.msra.mxu0 %v3080_v54 }
  0xdf   :  { %v418_v15 = vadd.f32 1.0, %v3254_v49  ;;  %2683 = vmatprep.mubr.f32.mxu1 %v448_v18  ;;  %3065 = vmatprep.subr.bf16.mxu1 %v3064_v45 }
  0xe0   :  { %v451_v6 = vmul.f32 %v419_v48, %v323_v26  ;;  %3085 = vmatprep.subr.bf16.mxu0 %v3084_v55 }
  0xe1   :  { %v450_v27 = vmul.f32 %v418_v15, %v322_v25  ;;  %v3256_v28 = vpop.eup %3255  ;;  %2684 = vmatmul.mubr.f32.gmra.mrb[10].mxu1 %v449_v56 }
  0xe2   :  { %v3258_v19 = vpop.eup %3257  ;;  %v421_v20 = vadd.f32 1.0, %v3256_v28  ;;  %3067 = vmatpush3.bf16.msra.mxu1 %v3064_v45  ;;  %3087 = vmatpush3.bf16.msra.mxu0 %v3084_v55 }
  0xe3   :  { %2686 = vmatprep.mubr.f32.mxu1 %v450_v27  ;;  %v420_v24 = vadd.f32 1.0, %v3258_v19  ;;  %3069 = vmatprep.subr.bf16.mxu1 %v3068_v32 }
  0xe4   :  { %v453_v35 = vmul.f32 %v421_v20, %v325_v58 }
  0xe5   :  { %2687 = vmatmul.mubr.f32.gmra.mrb[12].mxu1 %v451_v6  ;;  %v452_v30 = vmul.f32 %v420_v24, %v324_v29 }
  0xe6   :  { %3071 = vmatpush3.bf16.msra.mxu1 %v3068_v32 }
  0xe7   :  { %2689 = vmatprep.mubr.f32.mxu1 %v452_v30  ;;  %3073 = vmatprep.subr.bf16.mxu1 %v3072_v50 }
  0xe9   :  { %2690 = vmatmul.mubr.f32.gmra.mrb[14].mxu1 %v453_v35 }
  0xea   :  { %3075 = vmatpush3.bf16.msra.mxu1 %v3072_v50 }
 0x182   :  { %v2646_v3 = vpop.f32.mrb[0].mxu0 }
 0x183   :  { %v546_v1 = vadd.f32 %v2646_v3, %v3890_v0  ;;  %v540_v4 = vpop.f32.mrb[1].mxu0 }
 0x184   :  { %v541_v42 = vadd.f32 %v540_v4, %v3890_v0 }
 0x185   :  { %v732_v23 = vmul.f32 0.70710677, %v546_v1  ;;  %v700_v58 = vmul.f32 0.5, %v546_v1 }
 0x186   :  { %v731_v5 = vmul.f32 0.70710677, %v541_v42  ;;  %v2649_v9 = vpop.f32.mrb[2].mxu0  ;;  %v699_v28 = vmul.f32 0.5, %v541_v42 }
 0x187   :  { %3259 = verf.f32 %v732_v23  ;;  %v556_v33 = vadd.f32 %v2649_v9, %v3890_v0  ;;  %v550_v7 = vpop.f32.mrb[3].mxu0 }
 0x188   :  { %3261 = verf.f32 %v731_v5  ;;  %v551_v10 = vadd.f32 %v550_v7, %v3890_v0 }
 0x189   :  { %v734_v2 = vmul.f32 0.70710677, %v556_v33  ;;  %v702_v46 = vmul.f32 0.5, %v556_v33 }
 0x18a   :  { %v733_v11 = vmul.f32 0.70710677, %v551_v10  ;;  %v2652_v63 = vpop.f32.mrb[4].mxu0  ;;  %v701_v14 = vmul.f32 0.5, %v551_v10 }
 0x18b   :  { %3263 = verf.f32 %v734_v2  ;;  %v566_v43 = vadd.f32 %v2652_v63, %v3890_v0  ;;  %v560_v12 = vpop.f32.mrb[5].mxu0 }
 0x18c   :  { %3265 = verf.f32 %v733_v11  ;;  %v561_v41 = vadd.f32 %v560_v12, %v3890_v0 }
 0x18d   :  { %v736_v16 = vmul.f32 0.70710677, %v566_v43  ;;  %v704_v55 = vmul.f32 0.5, %v566_v43 }
 0x18e   :  { %v735_v57 = vmul.f32 0.70710677, %v561_v41  ;;  %v2655_v60 = vpop.f32.mrb[6].mxu0  ;;  %v703_v53 = vmul.f32 0.5, %v561_v41 }
 0x18f   :  { %3267 = verf.f32 %v736_v16  ;;  %v3899_v17 = vadd.f32 %v2655_v60, %v3890_v0  ;;  %v570_v49 = vpop.f32.mrb[7].mxu0 }
 0x190   :  { %3269 = verf.f32 %v735_v57  ;;  %v571_v18 = vadd.f32 %v570_v49, %v3890_v0 }
 0x191   :  { %v3260_v56 = vpop.eup %3259  ;;  %v738_v48 = vmul.f32 0.70710677, %v3899_v17  ;;  %v706_v63 = vmul.f32 0.5, %v3899_v17 }
 0x192   :  { %v3262_v25 = vpop.eup %3261  ;;  %v796_v15 = vadd.f32 1.0, %v3260_v56  ;;  %v737_v26 = vmul.f32 0.70710677, %v571_v18  ;;  %v2658_v27 = vpop.f32.mrb[8].mxu0  ;;  %v705_v7 = vmul.f32 0.5, %v571_v18 }
 0x193   :  { %v795_v6 = vadd.f32 1.0, %v3262_v25  ;;  %3271 = verf.f32 %v738_v48  ;;  %v3904_v19 = vadd.f32 %v2658_v27, %v3890_v0  ;;  %v580_v20 = vpop.f32.mrb[9].mxu0 }
 0x194   :  { %3273 = verf.f32 %v737_v26  ;;  %v3907_v29 = vadd.f32 %v580_v20, %v3890_v0  ;;  %v828_v37 = vmul.f32 %v796_v15, %v700_v58 }
 0x195   :  { %v3264_v24 = vpop.eup %3263  ;;  %v740_v30 = vmul.f32 0.70710677, %v3904_v19  ;;  %v827_v35 = vmul.f32 %v795_v6, %v699_v28  ;;  %v708_v28 = vmul.f32 0.5, %v3904_v19 }
 0x196   :  { %v3266_v36 = vpop.eup %3265  ;;  %v798_v8 = vadd.f32 1.0, %v3264_v24  ;;  %v739_v38 = vmul.f32 0.70710677, %v3907_v29  ;;  %v2661_v39 = vpop.f32.mrb[10].mxu0  ;;  %v707_v15 = vmul.f32 0.5, %v3907_v29 }
 0x197   :  { %v797_v40 = vadd.f32 1.0, %v3266_v36  ;;  %3275 = verf.f32 %v740_v30  ;;  %v3912_v44 = vadd.f32 %v2661_v39, %v3890_v0  ;;  %v590_v45 = vpop.f32.mrb[11].mxu0  ;;  %2724 = vmatprep.mubr.f32.mxu1 %v827_v35 }
 0x198   :  { %3277 = verf.f32 %v739_v38  ;;  %v3915_v47 = vadd.f32 %v590_v45, %v3890_v0  ;;  %2725 = vmatmul.mubr.f32.vlgmr.msra.gmra.mrb[16].mxu1 %v828_v37  ;;  %v830_v52 = vmul.f32 %v798_v8, %v702_v46 }
 0x199   :  { %v3268_v32 = vpop.eup %3267  ;;  %v742_v59 = vmul.f32 0.70710677, %v3912_v44  ;;  %v829_v13 = vmul.f32 %v797_v40, %v701_v14  ;;  %v710_v39 = vmul.f32 0.5, %v3912_v44 }
 0x19a   :  { %v3270_v50 = vpop.eup %3269  ;;  %v800_v34 = vadd.f32 1.0, %v3268_v32  ;;  %v741_v51 = vmul.f32 0.70710677, %v3915_v47  ;;  %v2664_v22 = vpop.f32.mrb[12].mxu0  ;;  %v709_v8 = vmul.f32 0.5, %v3915_v47 }
 0x19b   :  { %v799_v54 = vadd.f32 1.0, %v3270_v50  ;;  %3279 = verf.f32 %v742_v59  ;;  %v3920_v31 = vadd.f32 %v2664_v22, %v3890_v0  ;;  %v600_v21 = vpop.f32.mrb[13].mxu0  ;;  %2727 = vmatprep.mubr.f32.mxu1 %v829_v13 }
 0x19c   :  { %3281 = verf.f32 %v741_v51  ;;  %v3923_v62 = vadd.f32 %v600_v21, %v3890_v0  ;;  %2728 = vmatmul.mubr.f32.gmra.mrb[18].mxu1 %v830_v52  ;;  %v832_v33 = vmul.f32 %v800_v34, %v704_v55 }
 0x19d   :  { %v3272_v3 = vpop.eup %3271  ;;  %v744_v1 = vmul.f32 0.70710677, %v3920_v31  ;;  %v831_v4 = vmul.f32 %v799_v54, %v703_v53  ;;  %v712_v52 = vmul.f32 0.5, %v3920_v31 }
 0x19e   :  { %v3274_v42 = vpop.eup %3273  ;;  %v802_v23 = vadd.f32 1.0, %v3272_v3  ;;  %v743_v5 = vmul.f32 0.70710677, %v3923_v62  ;;  %v2667_v9 = vpop.f32.mrb[14].mxu0  ;;  %v711_v51 = vmul.f32 0.5, %v3923_v62 }
 0x19f   :  { %v801_v10 = vadd.f32 1.0, %v3274_v42  ;;  %3283 = verf.f32 %v744_v1  ;;  %v3928_v2 = vadd.f32 %v2667_v9, %v3890_v0  ;;  %v610_v11 = vpop.f32.mrb[15].mxu0  ;;  %2730 = vmatprep.mubr.f32.mxu1 %v831_v4 }
 0x1a0   :  { %3285 = verf.f32 %v743_v5  ;;  %v3932_v43 = vadd.f32 %v610_v11, %v3890_v0  ;;  %v2670_v12 = vpop.f32.mrb[0].mxu1  ;;  %2731 = vmatmul.mubr.f32.gmra.mrb[20].mxu1 %v832_v33  ;;  %v834_v25 = vmul.f32 %v802_v23, %v706_v63 }
 0x1a1   :  { %v3276_v41 = vpop.eup %3275  ;;  %v746_v16 = vmul.f32 0.70710677, %v3928_v2  ;;  %v3936_v57 = vadd.f32 %v2670_v12, %v3890_v0  ;;  %v620_v60 = vpop.f32.mrb[1].mxu1  ;;  %v833_v49 = vmul.f32 %v801_v10, %v705_v7  ;;  %v714_v10 = vmul.f32 0.5, %v3928_v2 }
 0x1a2   :  { %v3278_v18 = vpop.eup %3277  ;;  %v804_v56 = vadd.f32 1.0, %v3276_v41  ;;  %v745_v48 = vmul.f32 0.70710677, %v3932_v43  ;;  %v3940_v17 = vadd.f32 %v620_v60, %v3890_v0  ;;  %v713_v9 = vmul.f32 0.5, %v3932_v43 }
 0x1a3   :  { %v803_v26 = vadd.f32 1.0, %v3278_v18  ;;  %3287 = verf.f32 %v746_v16  ;;  %v748_v27 = vmul.f32 0.70710677, %v3936_v57  ;;  %2733 = vmatprep.mubr.f32.mxu1 %v833_v49 }
 0x1a4   :  { %3289 = verf.f32 %v745_v48  ;;  %v747_v6 = vmul.f32 0.70710677, %v3940_v17  ;;  %2734 = vmatmul.mubr.f32.gmra.mrb[22].mxu1 %v834_v25  ;;  %v2673_v58 = vpop.f32.mrb[2].mxu1  ;;  %v836_v37 = vmul.f32 %v804_v56, %v708_v28  ;;  %v715_v11 = vmul.f32 0.5, %v3940_v17 }
 0x1a5   :  { %v3280_v20 = vpop.eup %3279  ;;  %3291 = verf.f32 %v748_v27  ;;  %v835_v24 = vmul.f32 %v803_v26, %v707_v15  ;;  %v3947_v29 = vadd.f32 %v2673_v58, %v3890_v0  ;;  %v630_v36 = vpop.f32.mrb[3].mxu1  ;;  %v716_v48 = vmul.f32 0.5, %v3936_v57 }
 0x1a6   :  { %v3282_v30 = vpop.eup %3281  ;;  %v806_v35 = vadd.f32 1.0, %v3280_v20  ;;  %3293 = verf.f32 %v747_v6  ;;  %v631_v19 = vadd.f32 %v630_v36, %v3890_v0 }
 0x1a7   :  { %v805_v38 = vadd.f32 1.0, %v3282_v30  ;;  %2736 = vmatprep.mubr.f32.mxu1 %v835_v24  ;;  %v750_v14 = vmul.f32 0.70710677, %v3947_v29 }
 0x1a8   :  { %2737 = vmatmul.mubr.f32.gmra.mrb[24].mxu1 %v836_v37  ;;  %v749_v45 = vmul.f32 0.70710677, %v631_v19  ;;  %v2676_v46 = vpop.f32.mrb[4].mxu1  ;;  %v838_v34 = vmul.f32 %v806_v35, %v710_v39  ;;  %v717_v27 = vmul.f32 0.5, %v631_v19  ;;  %v718_v37 = vmul.f32 0.5, %v3947_v29 }
 0x1a9   :  { %v3284_v40 = vpop.eup %3283  ;;  %v837_v32 = vmul.f32 %v805_v38, %v709_v8  ;;  %3295 = verf.f32 %v750_v14  ;;  %v3954_v50 = vadd.f32 %v2676_v46, %v3890_v0  ;;  %v640_v47 = vpop.f32.mrb[5].mxu1 }
 0x1aa   :  { %v3286_v59 = vpop.eup %3285  ;;  %v808_v13 = vadd.f32 1.0, %v3284_v40  ;;  %3297 = verf.f32 %v749_v45  ;;  %v641_v44 = vadd.f32 %v640_v47, %v3890_v0 }
 0x1ab   :  { %v807_v22 = vadd.f32 1.0, %v3286_v59  ;;  %2739 = vmatprep.mubr.f32.mxu1 %v837_v32  ;;  %v752_v53 = vmul.f32 0.70710677, %v3954_v50  ;;  %v720_v47 = vmul.f32 0.5, %v3954_v50 }
 0x1ac   :  { %2740 = vmatmul.mubr.f32.gmra.mrb[26].mxu1 %v838_v34  ;;  %v751_v21 = vmul.f32 0.70710677, %v641_v44  ;;  %v2679_v55 = vpop.f32.mrb[6].mxu1  ;;  %v840_v23 = vmul.f32 %v808_v13, %v712_v52  ;;  %v719_v14 = vmul.f32 0.5, %v641_v44 }
 0x1ad   :  { %v3288_v54 = vpop.eup %3287  ;;  %v839_v3 = vmul.f32 %v807_v22, %v711_v51  ;;  %3299 = verf.f32 %v752_v53  ;;  %v3961_v42 = vadd.f32 %v2679_v55, %v3890_v0  ;;  %v650_v62 = vpop.f32.mrb[7].mxu1 }
 0x1ae   :  { %v3290_v1 = vpop.eup %3289  ;;  %v810_v4 = vadd.f32 1.0, %v3288_v54  ;;  %3301 = verf.f32 %v751_v21  ;;  %v651_v31 = vadd.f32 %v650_v62, %v3890_v0 }
 0x1af   :  { %v3292_v5 = vpop.eup %3291  ;;  %v809_v33 = vadd.f32 1.0, %v3290_v1  ;;  %2742 = vmatprep.mubr.f32.mxu1 %v839_v3  ;;  %v754_v63 = vmul.f32 0.70710677, %v3961_v42 }
 0x1b0   :  { %v3294_v7 = vpop.eup %3293  ;;  %2743 = vmatmul.mubr.f32.gmra.mrb[28].mxu1 %v840_v23  ;;  %v812_v12 = vadd.f32 1.0, %v3292_v5  ;;  %v753_v16 = vmul.f32 0.70710677, %v651_v31  ;;  %v2682_v60 = vpop.f32.mrb[8].mxu1  ;;  %v842_v56 = vmul.f32 %v810_v4, %v714_v10  ;;  %v721_v44 = vmul.f32 0.5, %v651_v31 }
 0x1b1   :  { %v811_v41 = vadd.f32 1.0, %v3294_v7  ;;  %v841_v49 = vmul.f32 %v809_v33, %v713_v9  ;;  %3303 = verf.f32 %v754_v63  ;;  %v3969_v43 = vadd.f32 %v2682_v60, %v3890_v0  ;;  %v660_v18 = vpop.f32.mrb[9].mxu1 }
 0x1b2   :  { %3305 = verf.f32 %v753_v16  ;;  %v661_v2 = vadd.f32 %v660_v18, %v3890_v0  ;;  %v844_v20 = vmul.f32 %v812_v12, %v716_v48  ;;  %v722_v23 = vmul.f32 0.5, %v3961_v42 }
 0x1b3   :  { %2745 = vmatprep.mubr.f32.mxu1 %v841_v49  ;;  %v843_v17 = vmul.f32 %v811_v41, %v715_v11  ;;  %v3296_v25 = vpop.eup %3295  ;;  %v756_v15 = vmul.f32 0.70710677, %v3969_v43  ;;  %v724_v41 = vmul.f32 0.5, %v3969_v43 }
 0x1b4   :  { %2746 = vmatmul.mubr.f32.gmra.mrb[30].mxu1 %v842_v56  ;;  %v3298_v26 = vpop.eup %3297  ;;  %v755_v28 = vmul.f32 0.70710677, %v661_v2  ;;  %v2685_v6 = vpop.f32.mrb[10].mxu1  ;;  %v814_v58 = vadd.f32 1.0, %v3296_v25  ;;  %v723_v31 = vmul.f32 0.5, %v661_v2 }
 0x1b5   :  { %2748 = vmatprep.mubr.f32.mxu1 %v843_v17  ;;  %v813_v24 = vadd.f32 1.0, %v3298_v26  ;;  %3307 = verf.f32 %v756_v15  ;;  %v3975_v57 = vadd.f32 %v2685_v6, %v3890_v0  ;;  %v670_v30 = vpop.f32.mrb[11].mxu1 }
 0x1b6   :  { %3309 = verf.f32 %v755_v28  ;;  %v671_v35 = vadd.f32 %v670_v30, %v3890_v0  ;;  %v846_v13 = vmul.f32 %v814_v58, %v718_v37 }
 0x1b7   :  { %v3300_v36 = vpop.eup %3299  ;;  %v758_v8 = vmul.f32 0.70710677, %v3975_v57  ;;  %v845_v38 = vmul.f32 %v813_v24, %v717_v27  ;;  %v726_v48 = vmul.f32 0.5, %v3975_v57 }
 0x1b8   :  { %2749 = vmatmul.mubr.f32.gmra.mrb[32].mxu1 %v844_v20  ;;  %v3302_v19 = vpop.eup %3301  ;;  %v816_v39 = vadd.f32 1.0, %v3300_v36  ;;  %v757_v40 = vmul.f32 0.70710677, %v671_v35  ;;  %v2688_v45 = vpop.f32.mrb[12].mxu1  ;;  %v725_v42 = vmul.f32 0.5, %v671_v35 }
 0x1b9   :  { %v815_v46 = vadd.f32 1.0, %v3302_v19  ;;  %3311 = verf.f32 %v758_v8  ;;  %v686_v32 = vadd.f32 %v2688_v45, %v3890_v0  ;;  %v680_v59 = vpop.f32.mrb[13].mxu1  ;;  %2751 = vmatprep.mubr.f32.mxu1 %v845_v38  ;;  %v1272_v8 = vld [vmem:[#allocation2 + $0x130] sm:$0xff]  ;;  %v1273_v38 = vld [vmem:[#allocation2 + $0x138] sm:$0xff] }
 0x1ba   :  { %3313 = verf.f32 %v757_v40  ;;  %v681_v29 = vadd.f32 %v680_v59, %v3890_v0  ;;  %v848_v21 = vmul.f32 %v816_v39, %v720_v47  ;;  %v3088_v19 = vpack.c.bf16 %v1273_v38, %v1272_v8  ;;  %v1274_v39 = vld [vmem:[#allocation2 + $0x140] sm:$0xff]  ;;  %v1276_v45 = vld [vmem:[#allocation2 + $0x150] sm:$0xff] }
 0x1bb   :  { %v3304_v34 = vpop.eup %3303  ;;  %v760_v51 = vmul.f32 0.70710677, %v686_v32  ;;  %v847_v22 = vmul.f32 %v815_v46, %v719_v14  ;;  %v728_v28 = vmul.f32 0.5, %v686_v32  ;;  %v1275_v14 = vld [vmem:[#allocation2 + $0x148] sm:$0xff]  ;;  %v1277_v46 = vld [vmem:[#allocation2 + $0x158] sm:$0xff]  ;;  %v1278_v59 = vld [vmem:[#allocation2 + $0x160] sm:$0xff] }
 0x1bc   :  { %2752 = vmatmul.mubr.f32.gmra.mrb[34].mxu1 %v846_v13  ;;  %v3306_v52 = vpop.eup %3305  ;;  %v759_v53 = vmul.f32 0.70710677, %v681_v29  ;;  %v2691_v54 = vpop.f32.mrb[14].mxu1  ;;  %v818_v55 = vadd.f32 1.0, %v3304_v34  ;;  %v727_v15 = vmul.f32 0.5, %v681_v29  ;;  %3089 = vmatprep.subr.bf16.mxu0 %v3088_v19  ;;  %v3092_v40 = vpack.c.bf16 %v1275_v14, %v1274_v39  ;;  %v1279_v13 = vld [vmem:[#allocation2 + $0x168] sm:$0xff] }
 0x1bd   :  { %v817_v3 = vadd.f32 1.0, %v3306_v52  ;;  %3315 = verf.f32 %v760_v51  ;;  %v696_v1 = vadd.f32 %v2691_v54, %v3890_v0  ;;  %v690_v4 = vpop.f32.mrb[15].mxu1  ;;  %2754 = vmatprep.mubr.f32.mxu1 %v847_v22  ;;  %3091 = vmatpush3.bf16.msra.mxu0 %v3088_v19  ;;  %v3096_v32 = vpack.c.bf16 %v1277_v46, %v1276_v45  ;;  %v1280_v29 = vld [vmem:[#allocation2 + $0x170] sm:$0xff]  ;;  %v1281_v34 = vld [vmem:[#allocation2 + $0x178] sm:$0xff]  ;;  %v1672_v22 = vld [vmem:[#allocation2 + $0x180] sm:$0xff] }
 0x1be   :  { %3317 = verf.f32 %v759_v53  ;;  %v691_v50 = vadd.f32 %v690_v4, %v3890_v0  ;;  %v850_v63 = vmul.f32 %v818_v55, %v722_v23  ;;  %3093 = vmatprep.subr.bf16.mxu0 %v3092_v40  ;;  %v3100_v47 = vpack.c.bf16 %v1279_v13, %v1278_v59  ;;  %v1673_v52 = vld [vmem:[#allocation2 + $0x188] sm:$0xff]  ;;  %v1675_v54 = vld [vmem:[#allocation2 + $0x198] sm:$0xff]  ;;  %v1676_v55 = vld [vmem:[#allocation2 + $0x1a0] sm:$0xff] }
 0x1bf   :  { %v3308_v62 = vpop.eup %3307  ;;  %v762_v5 = vmul.f32 0.70710677, %v696_v1  ;;  %v849_v9 = vmul.f32 %v817_v3, %v721_v44  ;;  %v730_v36 = vmul.f32 0.5, %v696_v1  ;;  %v3104_v51 = vpack.c.bf16 %v1281_v34, %v1280_v29  ;;  %v1674_v44 = vld [vmem:[#allocation2 + $0x190] sm:$0xff]  ;;  %v1677_v3 = vld [vmem:[#allocation2 + $0x1a8] sm:$0xff]  ;;  %v1680_v23 = vld [vmem:[#allocation2 + $0x1c0] sm:$0xff] }
 0x1c0   :  { %2755 = vmatmul.mubr.f32.gmra.mrb[36].mxu1 %v848_v21  ;;  %v3310_v33 = vpop.eup %3309  ;;  %v761_v7 = vmul.f32 0.70710677, %v691_v50  ;;  %v820_v10 = vadd.f32 1.0, %v3308_v62  ;;  %v729_v24 = vmul.f32 0.5, %v691_v50  ;;  %v3108_v53 = vpack.c.bf16 %v1673_v52, %v1672_v22  ;;  %v1678_v4 = vld [vmem:[#allocation2 + $0x1b0] sm:$0xff]  ;;  %v1679_v50 = vld [vmem:[#allocation2 + $0x1b8] sm:$0xff] }
 0x1c1   :  { %v819_v11 = vadd.f32 1.0, %v3310_v33  ;;  %3319 = verf.f32 %v762_v5  ;;  %2757 = vmatprep.mubr.f32.mxu1 %v849_v9  ;;  %3095 = vmatpush3.bf16.msra.mxu0 %v3092_v40  ;;  %v3112_v21 = vpack.c.bf16 %v1675_v54, %v1674_v44  ;;  %v3116_v1 = vpack.c.bf16 %v1677_v3, %v1676_v55  ;;  %v1681_v5 = vld [vmem:[#allocation2 + $0x1c8] sm:$0xff]  ;;  %v1682_v33 = vld [vmem:[#allocation2 + $0x1d0] sm:$0xff] }
 0x1c2   :  { %3321 = verf.f32 %v761_v7  ;;  %v852_v18 = vmul.f32 %v820_v10, %v724_v41  ;;  %3097 = vmatprep.subr.bf16.mxu0 %v3096_v32  ;;  %3109 = vmatprep.subr.bf16.mxu1 %v3108_v53  ;;  %v3120_v62 = vpack.c.bf16 %v1679_v50, %v1678_v4  ;;  %v3124_v9 = vpack.c.bf16 %v1681_v5, %v1680_v23 }
 0x1c3   :  { %v3312_v12 = vpop.eup %3311  ;;  %v851_v0 = vmul.f32 %v819_v11, %v723_v31  ;;  %3111 = vmatpush3.bf16.msra.mxu1 %v3108_v53  ;;  %v1683_v31 = vld [vmem:[#allocation2 + $0x1d8] sm:$0xff]  ;;  %v878_v10 = vsub.s32 3, %v3704_v61 }
 0x1c4   :  { %2758 = vmatmul.mubr.f32.gmra.mrb[38].mxu1 %v850_v63  ;;  %v3314_v16 = vpop.eup %3313  ;;  %v822_v60 = vadd.f32 1.0, %v3312_v12  ;;  %3113 = vmatprep.subr.bf16.mxu1 %v3112_v21  ;;  %v3128_v7 = vpack.c.bf16 %v1683_v31, %v1682_v33  ;;  %v3992_v11 = vld [vmem:[%s4399_s2] sm:$0xff] }
 0x1c5   :  { %v821_v49 = vadd.f32 1.0, %v3314_v16  ;;  %2760 = vmatprep.mubr.f32.mxu1 %v851_v0  ;;  %3099 = vmatpush3.bf16.msra.mxu0 %v3096_v32  ;;  %v3995_v63 = vrot.slane %v3992_v11, %v878_v10 }
 0x1c6   :  { %v854_v27 = vmul.f32 %v822_v60, %v726_v48  ;;  %3101 = vmatprep.subr.bf16.mxu0 %v3100_v47 }
 0x1c7   :  { %v3316_v56 = vpop.eup %3315  ;;  %v853_v2 = vmul.f32 %v821_v49, %v725_v42  ;;  %3115 = vmatpush3.bf16.msra.mxu1 %v3112_v21 }
 0x1c8   :  { %2761 = vmatmul.mubr.f32.gmra.mrb[40].mxu1 %v852_v18  ;;  %v3318_v17 = vpop.eup %3317  ;;  %v824_v25 = vadd.f32 1.0, %v3316_v56  ;;  %3117 = vmatprep.subr.bf16.mxu1 %v3116_v1 }
 0x1c9   :  { %v823_v26 = vadd.f32 1.0, %v3318_v17  ;;  %2763 = vmatprep.mubr.f32.mxu1 %v853_v2  ;;  %3103 = vmatpush3.bf16.msra.mxu0 %v3100_v47 }
 0x1ca   :  { %v856_v35 = vmul.f32 %v824_v25, %v728_v28  ;;  %3105 = vmatprep.subr.bf16.mxu0 %v3104_v51 }
 0x1cb   :  { %v3320_v43 = vpop.eup %3319  ;;  %v855_v6 = vmul.f32 %v823_v26, %v727_v15  ;;  %3119 = vmatpush3.bf16.msra.mxu1 %v3116_v1 }
 0x1cc   :  { %2764 = vmatmul.mubr.f32.gmra.mrb[42].mxu1 %v854_v27  ;;  %v3322_v20 = vpop.eup %3321  ;;  %v826_v58 = vadd.f32 1.0, %v3320_v43  ;;  %3121 = vmatprep.subr.bf16.mxu1 %v3120_v62 }
 0x1cd   :  { %v825_v30 = vadd.f32 1.0, %v3322_v20  ;;  %2766 = vmatprep.mubr.f32.mxu1 %v855_v6  ;;  %3107 = vmatpush3.bf16.msra.mxu0 %v3104_v51 }
 0x1ce   :  { %v858_v37 = vmul.f32 %v826_v58, %v730_v36 }
 0x1cf   :  { %v857_v57 = vmul.f32 %v825_v30, %v729_v24  ;;  %3123 = vmatpush3.bf16.msra.mxu1 %v3120_v62 }
 0x1d0   :  { %2767 = vmatmul.mubr.f32.gmra.mrb[44].mxu1 %v856_v35  ;;  %3125 = vmatprep.subr.bf16.mxu1 %v3124_v9 }
 0x1d1   :  { %2769 = vmatprep.mubr.f32.mxu1 %v857_v57 }
 0x1d3   :  { %3127 = vmatpush3.bf16.msra.mxu1 %v3124_v9 }
 0x1d4   :  { %2770 = vmatmul.mubr.f32.gmra.mrb[46].mxu1 %v858_v37  ;;  %3129 = vmatprep.subr.bf16.mxu1 %v3128_v7 }
 0x1d7   :  { %3131 = vmatpush3.bf16.msra.mxu1 %v3128_v7 }
 0x26b   :  { %v2726_v12 = vpop.f32.mrb[16].mxu1 }
 0x26c   :  { %v952_v41 = vadd.f32 %v2726_v12, %v3995_v63  ;;  %v946_v0 = vpop.f32.mrb[17].mxu1 }
 0x26d   :  { %v947_v16 = vadd.f32 %v946_v0, %v3995_v63 }
 0x26e   :  { %v1138_v60 = vmul.f32 0.70710677, %v952_v41  ;;  %v1106_v40 = vmul.f32 0.5, %v952_v41 }
 0x26f   :  { %v1137_v42 = vmul.f32 0.70710677, %v947_v16  ;;  %v2729_v49 = vpop.f32.mrb[18].mxu1  ;;  %v1105_v38 = vmul.f32 0.5, %v947_v16 }
 0x270   :  { %3323 = verf.f32 %v1138_v60  ;;  %v962_v18 = vadd.f32 %v2729_v49, %v3995_v63  ;;  %v956_v56 = vpop.f32.mrb[19].mxu1 }
 0x271   :  { %3325 = verf.f32 %v1137_v42  ;;  %v957_v48 = vadd.f32 %v956_v56, %v3995_v63 }
 0x272   :  { %v1140_v2 = vmul.f32 0.70710677, %v962_v18  ;;  %v1108_v54 = vmul.f32 0.5, %v962_v18 }
 0x273   :  { %v1139_v17 = vmul.f32 0.70710677, %v957_v48  ;;  %v2732_v25 = vpop.f32.mrb[20].mxu1  ;;  %v1107_v22 = vmul.f32 0.5, %v957_v48 }
 0x274   :  { %3327 = verf.f32 %v1140_v2  ;;  %v972_v15 = vadd.f32 %v2732_v25, %v3995_v63  ;;  %v966_v26 = vpop.f32.mrb[21].mxu1 }
 0x275   :  { %3329 = verf.f32 %v1139_v17  ;;  %v967_v27 = vadd.f32 %v966_v26, %v3995_v63 }
 0x276   :  { %v1142_v43 = vmul.f32 0.70710677, %v972_v15  ;;  %v1110_v10 = vmul.f32 0.5, %v972_v15 }
 0x277   :  { %v1141_v28 = vmul.f32 0.70710677, %v967_v27  ;;  %v2735_v6 = vpop.f32.mrb[22].mxu1  ;;  %v1109_v9 = vmul.f32 0.5, %v967_v27 }
 0x278   :  { %3331 = verf.f32 %v1142_v43  ;;  %v4004_v20 = vadd.f32 %v2735_v6, %v3995_v63  ;;  %v976_v58 = vpop.f32.mrb[23].mxu1 }
 0x279   :  { %3333 = verf.f32 %v1141_v28  ;;  %v977_v24 = vadd.f32 %v976_v58, %v3995_v63 }
 0x27a   :  { %v3324_v30 = vpop.eup %3323  ;;  %v1144_v35 = vmul.f32 0.70710677, %v4004_v20  ;;  %v1112_v15 = vmul.f32 0.5, %v4004_v20 }
 0x27b   :  { %v3326_v36 = vpop.eup %3325  ;;  %v1202_v57 = vadd.f32 1.0, %v3324_v30  ;;  %v1143_v37 = vmul.f32 0.70710677, %v977_v24  ;;  %v2738_v8 = vpop.f32.mrb[24].mxu1  ;;  %v1111_v48 = vmul.f32 0.5, %v977_v24 }
 0x27c   :  { %v1201_v19 = vadd.f32 1.0, %v3326_v36  ;;  %3335 = verf.f32 %v1144_v35  ;;  %v4009_v39 = vadd.f32 %v2738_v8, %v3995_v63  ;;  %v986_v14 = vpop.f32.mrb[25].mxu1 }
 0x27d   :  { %3337 = verf.f32 %v1143_v37  ;;  %v4012_v45 = vadd.f32 %v986_v14, %v3995_v63  ;;  %v1234_v47 = vmul.f32 %v1202_v57, %v1106_v40 }
 0x27e   :  { %v3328_v46 = vpop.eup %3327  ;;  %v1146_v32 = vmul.f32 0.70710677, %v4009_v39  ;;  %v1233_v59 = vmul.f32 %v1201_v19, %v1105_v38  ;;  %v1114_v8 = vmul.f32 0.5, %v4009_v39 }
 0x27f   :  { %v3330_v13 = vpop.eup %3329  ;;  %v1204_v29 = vadd.f32 1.0, %v3328_v46  ;;  %v1145_v34 = vmul.f32 0.70710677, %v4012_v45  ;;  %v2741_v51 = vpop.f32.mrb[26].mxu1  ;;  %v1113_v36 = vmul.f32 0.5, %v4012_v45 }
 0x280   :  { %v1203_v52 = vadd.f32 1.0, %v3330_v13  ;;  %3339 = verf.f32 %v1146_v32  ;;  %v4017_v44 = vadd.f32 %v2741_v51, %v3995_v63  ;;  %v996_v53 = vpop.f32.mrb[27].mxu1  ;;  %2804 = vmatprep.mubr.f32.mxu0 %v1233_v59 }
 0x281   :  { %3341 = verf.f32 %v1145_v34  ;;  %v4020_v21 = vadd.f32 %v996_v53, %v3995_v63  ;;  %2805 = vmatmul.mubr.f32.vlgmr.msra.gmra.mrb[16].mxu0 %v1234_v47  ;;  %v1236_v5 = vmul.f32 %v1204_v29, %v1108_v54 }
 0x282   :  { %v3332_v55 = vpop.eup %3331  ;;  %v1148_v3 = vmul.f32 0.70710677, %v4017_v44  ;;  %v1235_v1 = vmul.f32 %v1203_v52, %v1107_v22  ;;  %v1116_v51 = vmul.f32 0.5, %v4017_v44 }
 0x283   :  { %v3334_v4 = vpop.eup %3333  ;;  %v1206_v50 = vadd.f32 1.0, %v3332_v55  ;;  %v1147_v62 = vmul.f32 0.70710677, %v4020_v21  ;;  %v2744_v23 = vpop.f32.mrb[28].mxu1  ;;  %v1115_v47 = vmul.f32 0.5, %v4020_v21 }
 0x284   :  { %v1205_v33 = vadd.f32 1.0, %v3334_v4  ;;  %3343 = verf.f32 %v1148_v3  ;;  %v4025_v31 = vadd.f32 %v2744_v23, %v3995_v63  ;;  %v1006_v7 = vpop.f32.mrb[29].mxu1  ;;  %2807 = vmatprep.mubr.f32.mxu0 %v1235_v1 }
 0x285   :  { %3345 = verf.f32 %v1147_v62  ;;  %v4028_v12 = vadd.f32 %v1006_v7, %v3995_v63  ;;  %2808 = vmatmul.mubr.f32.gmra.mrb[18].mxu0 %v1236_v5  ;;  %v1238_v56 = vmul.f32 %v1206_v50, %v1110_v10 }
 0x286   :  { %v3336_v41 = vpop.eup %3335  ;;  %v1150_v0 = vmul.f32 0.70710677, %v4025_v31  ;;  %v1237_v16 = vmul.f32 %v1205_v33, %v1109_v9  ;;  %v1118_v5 = vmul.f32 0.5, %v4025_v31 }
 0x287   :  { %v3338_v60 = vpop.eup %3337  ;;  %v1208_v42 = vadd.f32 1.0, %v3336_v41  ;;  %v1149_v49 = vmul.f32 0.70710677, %v4028_v12  ;;  %v2747_v18 = vpop.f32.mrb[30].mxu1  ;;  %v1117_v50 = vmul.f32 0.5, %v4028_v12 }
 0x288   :  { %v1207_v2 = vadd.f32 1.0, %v3338_v60  ;;  %3347 = verf.f32 %v1150_v0  ;;  %v4033_v17 = vadd.f32 %v2747_v18, %v3995_v63  ;;  %v1016_v25 = vpop.f32.mrb[31].mxu1  ;;  %2810 = vmatprep.mubr.f32.mxu0 %v1237_v16 }
 0x289   :  { %3349 = verf.f32 %v1149_v49  ;;  %v4037_v26 = vadd.f32 %v1016_v25, %v3995_v63  ;;  %2811 = vmatmul.mubr.f32.gmra.mrb[20].mxu0 %v1238_v56  ;;  %v1240_v35 = vmul.f32 %v1208_v42, %v1112_v15 }
 0x28a   :  { %v3340_v27 = vpop.eup %3339  ;;  %v1152_v43 = vmul.f32 0.70710677, %v4033_v17  ;;  %v1239_v28 = vmul.f32 %v1207_v2, %v1111_v48  ;;  %v1120_v56 = vmul.f32 0.5, %v4033_v17 }
 0x28b   :  { %v3342_v6 = vpop.eup %3341  ;;  %v1210_v58 = vadd.f32 1.0, %v3340_v27  ;;  %v1151_v24 = vmul.f32 0.70710677, %v4037_v26  ;;  %v2750_v30 = vpop.f32.mrb[32].mxu1  ;;  %v1119_v42 = vmul.f32 0.5, %v4037_v26 }
 0x28c   :  { %v1209_v57 = vadd.f32 1.0, %v3342_v6  ;;  %3351 = verf.f32 %v1152_v43  ;;  %v4043_v20 = vadd.f32 %v2750_v30, %v3995_v63  ;;  %v1026_v37 = vpop.f32.mrb[33].mxu1  ;;  %2813 = vmatprep.mubr.f32.mxu0 %v1239_v28 }
 0x28d   :  { %3353 = verf.f32 %v1151_v24  ;;  %v4047_v38 = vadd.f32 %v1026_v37, %v3995_v63  ;;  %2814 = vmatmul.mubr.f32.gmra.mrb[22].mxu0 %v1240_v35  ;;  %v1242_v13 = vmul.f32 %v1210_v58, %v1114_v8 }
 0x28e   :  { %v3344_v19 = vpop.eup %3343  ;;  %v1154_v14 = vmul.f32 0.70710677, %v4043_v20  ;;  %v1241_v40 = vmul.f32 %v1209_v57, %v1113_v36  ;;  %v1122_v35 = vmul.f32 0.5, %v4043_v20 }
 0x28f   :  { %v3346_v46 = vpop.eup %3345  ;;  %v1212_v45 = vadd.f32 1.0, %v3344_v19  ;;  %v1153_v32 = vmul.f32 0.70710677, %v4047_v38  ;;  %v2753_v59 = vpop.f32.mrb[34].mxu1  ;;  %v1121_v58 = vmul.f32 0.5, %v4047_v38 }
 0x290   :  { %v1211_v29 = vadd.f32 1.0, %v3346_v46  ;;  %3355 = verf.f32 %v1154_v14  ;;  %v4053_v39 = vadd.f32 %v2753_v59, %v3995_v63  ;;  %v1036_v34 = vpop.f32.mrb[35].mxu1  ;;  %2816 = vmatprep.mubr.f32.mxu0 %v1241_v40 }
 0x291   :  { %3357 = verf.f32 %v1153_v32  ;;  %v4057_v22 = vadd.f32 %v1036_v34, %v3995_v63  ;;  %2817 = vmatmul.mubr.f32.gmra.mrb[24].mxu0 %v1242_v13  ;;  %v1244_v4 = vmul.f32 %v1212_v45, %v1116_v51 }
 0x292   :  { %v3348_v52 = vpop.eup %3347  ;;  %v1156_v53 = vmul.f32 0.70710677, %v4053_v39  ;;  %v1243_v54 = vmul.f32 %v1211_v29, %v1115_v47  ;;  %v1124_v13 = vmul.f32 0.5, %v4053_v39 }
 0x293   :  { %v3350_v55 = vpop.eup %3349  ;;  %v1214_v21 = vadd.f32 1.0, %v3348_v52  ;;  %v1155_v3 = vmul.f32 0.70710677, %v4057_v22  ;;  %v2756_v1 = vpop.f32.mrb[36].mxu1  ;;  %v1123_v45 = vmul.f32 0.5, %v4057_v22 }
 0x294   :  { %v1213_v62 = vadd.f32 1.0, %v3350_v55  ;;  %3359 = verf.f32 %v1156_v53  ;;  %v4063_v44 = vadd.f32 %v2756_v1, %v3995_v63  ;;  %v1046_v23 = vpop.f32.mrb[37].mxu1  ;;  %2819 = vmatprep.mubr.f32.mxu0 %v1243_v54 }
 0x295   :  { %3361 = verf.f32 %v1155_v3  ;;  %v4067_v9 = vadd.f32 %v1046_v23, %v3995_v63  ;;  %2820 = vmatmul.mubr.f32.gmra.mrb[26].mxu0 %v1244_v4  ;;  %v1246_v60 = vmul.f32 %v1214_v21, %v1118_v5 }
 0x296   :  { %v3352_v33 = vpop.eup %3351  ;;  %v1158_v7 = vmul.f32 0.70710677, %v4063_v44  ;;  %v1245_v10 = vmul.f32 %v1213_v62, %v1117_v50  ;;  %v1126_v4 = vmul.f32 0.5, %v4063_v44 }
 0x297   :  { %v3354_v41 = vpop.eup %3353  ;;  %v1216_v12 = vadd.f32 1.0, %v3352_v33  ;;  %v1157_v0 = vmul.f32 0.70710677, %v4067_v9  ;;  %v2759_v16 = vpop.f32.mrb[38].mxu1  ;;  %v1125_v21 = vmul.f32 0.5, %v4067_v9 }
 0x298   :  { %v1215_v49 = vadd.f32 1.0, %v3354_v41  ;;  %3363 = verf.f32 %v1158_v7  ;;  %v4073_v31 = vadd.f32 %v2759_v16, %v3995_v63  ;;  %v1056_v18 = vpop.f32.mrb[39].mxu1  ;;  %2822 = vmatprep.mubr.f32.mxu0 %v1245_v10 }
 0x299   :  { %3365 = verf.f32 %v1157_v0  ;;  %v4077_v48 = vadd.f32 %v1056_v18, %v3995_v63  ;;  %2823 = vmatmul.mubr.f32.gmra.mrb[28].mxu0 %v1246_v60  ;;  %v1248_v6 = vmul.f32 %v1216_v12, %v1120_v56 }
 0x29a   :  { %v3356_v2 = vpop.eup %3355  ;;  %v1160_v25 = vmul.f32 0.70710677, %v4073_v31  ;;  %v1247_v15 = vmul.f32 %v1215_v49, %v1119_v42  ;;  %v1128_v44 = vmul.f32 0.5, %v4073_v31 }
 0x29b   :  { %v3358_v27 = vpop.eup %3357  ;;  %v1218_v26 = vadd.f32 1.0, %v3356_v2  ;;  %v1159_v43 = vmul.f32 0.70710677, %v4077_v48  ;;  %v2762_v28 = vpop.f32.mrb[40].mxu1  ;;  %v1127_v12 = vmul.f32 0.5, %v4077_v48 }
 0x29c   :  { %v1217_v24 = vadd.f32 1.0, %v3358_v27  ;;  %3367 = verf.f32 %v1160_v25  ;;  %v4083_v17 = vadd.f32 %v2762_v28, %v3995_v63  ;;  %v1066_v30 = vpop.f32.mrb[41].mxu1  ;;  %2825 = vmatprep.mubr.f32.mxu0 %v1247_v15 }
 0x29d   :  { %3369 = verf.f32 %v1159_v43  ;;  %v4087_v36 = vadd.f32 %v1066_v30, %v3995_v63  ;;  %2826 = vmatmul.mubr.f32.gmra.mrb[30].mxu0 %v1248_v6  ;;  %v1250_v46 = vmul.f32 %v1218_v26, %v1122_v35 }
 0x29e   :  { %v3360_v57 = vpop.eup %3359  ;;  %v1162_v37 = vmul.f32 0.70710677, %v4083_v17  ;;  %v1249_v8 = vmul.f32 %v1217_v24, %v1121_v58  ;;  %v1130_v43 = vmul.f32 0.5, %v4083_v17 }
 0x29f   :  { %v3362_v19 = vpop.eup %3361  ;;  %v1220_v38 = vadd.f32 1.0, %v3360_v57  ;;  %v1161_v14 = vmul.f32 0.70710677, %v4087_v36  ;;  %v2765_v40 = vpop.f32.mrb[42].mxu1  ;;  %v1129_v48 = vmul.f32 0.5, %v4087_v36 }
 0x2a0   :  { %v1219_v32 = vadd.f32 1.0, %v3362_v19  ;;  %3371 = verf.f32 %v1162_v37  ;;  %v4093_v20 = vadd.f32 %v2765_v40, %v3995_v63  ;;  %v1076_v59 = vpop.f32.mrb[43].mxu1  ;;  %2828 = vmatprep.mubr.f32.mxu0 %v1249_v8 }
 0x2a1   :  { %3373 = verf.f32 %v1161_v14  ;;  %v1077_v47 = vadd.f32 %v1076_v59, %v3995_v63  ;;  %2829 = vmatmul.mubr.f32.gmra.mrb[32].mxu0 %v1250_v46  ;;  %v1252_v55 = vmul.f32 %v1220_v38, %v1124_v13 }
 0x2a2   :  { %v3364_v29 = vpop.eup %3363  ;;  %v1164_v34 = vmul.f32 0.70710677, %v4093_v20  ;;  %v1251_v51 = vmul.f32 %v1219_v32, %v1123_v45  ;;  %v1132_v35 = vmul.f32 0.5, %v4093_v20 }
 0x2a3   :  { %v3366_v52 = vpop.eup %3365  ;;  %v1222_v53 = vadd.f32 1.0, %v3364_v29  ;;  %v1163_v22 = vmul.f32 0.70710677, %v1077_v47  ;;  %v2768_v54 = vpop.f32.mrb[44].mxu1  ;;  %v1131_v24 = vmul.f32 0.5, %v1077_v47 }
 0x2a4   :  { %v1221_v3 = vadd.f32 1.0, %v3366_v52  ;;  %3375 = verf.f32 %v1164_v34  ;;  %v1092_v1 = vadd.f32 %v2768_v54, %v3995_v63  ;;  %v1086_v39 = vpop.f32.mrb[45].mxu1  ;;  %2831 = vmatprep.mubr.f32.mxu0 %v1251_v51  ;;  %v1684_v51 = vld [vmem:[#allocation2 + $0x1e0] sm:$0xff]  ;;  %v1685_v52 = vld [vmem:[#allocation2 + $0x1e8] sm:$0xff]  ;;  %v1687_v54 = vld [vmem:[#allocation2 + $0x1f8] sm:$0xff] }
 0x2a5   :  { %3377 = verf.f32 %v1163_v22  ;;  %v1087_v50 = vadd.f32 %v1086_v39, %v3995_v63  ;;  %2832 = vmatmul.mubr.f32.gmra.mrb[34].mxu0 %v1252_v55  ;;  %v1254_v9 = vmul.f32 %v1222_v53, %v1126_v4  ;;  %v3132_v53 = vpack.c.bf16 %v1685_v52, %v1684_v51  ;;  %v1686_v22 = vld [vmem:[#allocation2 + $0x1f0] sm:$0xff]  ;;  %v2081_v4 = vld [vmem:[#allocation2 + $0x218] sm:$0xff] }
 0x2a6   :  { %v3368_v62 = vpop.eup %3367  ;;  %v1166_v23 = vmul.f32 0.70710677, %v1092_v1  ;;  %v1253_v5 = vmul.f32 %v1221_v3, %v1125_v21  ;;  %v1134_v14 = vmul.f32 0.5, %v1092_v1  ;;  %v3136_v55 = vpack.c.bf16 %v1687_v54, %v1686_v22  ;;  %v2078_v21 = vld [vmem:[#allocation2 + $0x200] sm:$0xff]  ;;  %v2079_v3 = vld [vmem:[#allocation2 + $0x208] sm:$0xff]  ;;  %v2080_v1 = vld [vmem:[#allocation2 + $0x210] sm:$0xff] }
 0x2a7   :  { %v3370_v33 = vpop.eup %3369  ;;  %v1224_v7 = vadd.f32 1.0, %v3368_v62  ;;  %v1165_v10 = vmul.f32 0.70710677, %v1087_v50  ;;  %v2771_v41 = vpop.f32.mrb[46].mxu1  ;;  %v1133_v38 = vmul.f32 0.5, %v1087_v50  ;;  %3133 = vmatprep.subr.bf16.mxu1 %v3132_v53  ;;  %v3140_v39 = vpack.c.bf16 %v2079_v3, %v2078_v21  ;;  %v2082_v62 = vld [vmem:[#allocation2 + $0x220] sm:$0xff] }
 0x2a8   :  { %v1223_v0 = vadd.f32 1.0, %v3370_v33  ;;  %3379 = verf.f32 %v1166_v23  ;;  %v1102_v16 = vadd.f32 %v2771_v41, %v3995_v63  ;;  %v1096_v60 = vpop.f32.mrb[47].mxu1  ;;  %2834 = vmatprep.mubr.f32.mxu0 %v1253_v5  ;;  %3135 = vmatpush3.bf16.msra.mxu1 %v3132_v53  ;;  %v3144_v50 = vpack.c.bf16 %v2081_v4, %v2080_v1  ;;  %v2083_v23 = vld [vmem:[#allocation2 + $0x228] sm:$0xff]  ;;  %v2084_v33 = vld [vmem:[#allocation2 + $0x230] sm:$0xff]  ;;  %v2086_v41 = vld [vmem:[#allocation2 + $0x240] sm:$0xff] }
 0x2a9   :  { %3381 = verf.f32 %v1165_v10  ;;  %v1097_v42 = vadd.f32 %v1096_v60, %v3995_v63  ;;  %2835 = vmatmul.mubr.f32.gmra.mrb[36].mxu0 %v1254_v9  ;;  %v1256_v27 = vmul.f32 %v1224_v7, %v1128_v44  ;;  %3137 = vmatprep.subr.bf16.mxu1 %v3136_v55  ;;  %v3148_v5 = vpack.c.bf16 %v2083_v23, %v2082_v62  ;;  %v2085_v7 = vld [vmem:[#allocation2 + $0x238] sm:$0xff]  ;;  %v2087_v9 = vld [vmem:[#allocation2 + $0x248] sm:$0xff] }
 0x2aa   :  { %v3372_v49 = vpop.eup %3371  ;;  %v1168_v18 = vmul.f32 0.70710677, %v1102_v16  ;;  %v1255_v56 = vmul.f32 %v1223_v0, %v1127_v12  ;;  %v1136_v20 = vmul.f32 0.5, %v1102_v16  ;;  %3141 = vmatprep.subr.bf16.mxu0 %v3140_v39  ;;  %v3152_v10 = vpack.c.bf16 %v2085_v7, %v2084_v33  ;;  %v2088_v0 = vld [vmem:[#allocation2 + $0x250] sm:$0xff]  ;;  %v2089_v16 = vld [vmem:[#allocation2 + $0x258] sm:$0xff] }
 0x2ab   :  { %v3374_v2 = vpop.eup %3373  ;;  %v1226_v25 = vadd.f32 1.0, %v3372_v49  ;;  %v1167_v15 = vmul.f32 0.70710677, %v1097_v42  ;;  %v1135_v13 = vmul.f32 0.5, %v1097_v42  ;;  %3143 = vmatpush3.bf16.msra.mxu0 %v3140_v39  ;;  %v3156_v12 = vpack.c.bf16 %v2087_v9, %v2086_v41 }
 0x2ac   :  { %v1225_v26 = vadd.f32 1.0, %v3374_v2  ;;  %3383 = verf.f32 %v1168_v18  ;;  %2837 = vmatprep.mubr.f32.mxu0 %v1255_v56  ;;  %3139 = vmatpush3.bf16.msra.mxu1 %v3136_v55  ;;  %v3160_v60 = vpack.c.bf16 %v2089_v16, %v2088_v0  ;;  %v1284_v44 = vsub.s32 4, %v3704_v61 }
 0x2ad   :  { %3385 = verf.f32 %v1167_v15  ;;  %2838 = vmatmul.mubr.f32.gmra.mrb[38].mxu0 %v1256_v27  ;;  %v1258_v58 = vmul.f32 %v1226_v25, %v1130_v43  ;;  %3145 = vmatprep.subr.bf16.mxu0 %v3144_v50 }
 0x2ae   :  { %v3376_v31 = vpop.eup %3375  ;;  %v1257_v28 = vmul.f32 %v1225_v26, %v1129_v48  ;;  %v4111_v42 = vrot.slane %v3992_v11, %v1284_v44 }
 0x2af   :  { %v3378_v63 = vpop.eup %3377  ;;  %v1228_v6 = vadd.f32 1.0, %v3376_v31  ;;  %3147 = vmatpush3.bf16.msra.mxu0 %v3144_v50 }
 0x2b0   :  { %v1227_v30 = vadd.f32 1.0, %v3378_v63  ;;  %2840 = vmatprep.mubr.f32.mxu0 %v1257_v28  ;;  %3149 = vmatprep.subr.bf16.mxu0 %v3148_v5 }
 0x2b1   :  { %2841 = vmatmul.mubr.f32.gmra.mrb[40].mxu0 %v1258_v58  ;;  %v1260_v19 = vmul.f32 %v1228_v6, %v1132_v35 }
 0x2b2   :  { %v3380_v57 = vpop.eup %3379  ;;  %v1259_v36 = vmul.f32 %v1227_v30, %v1131_v24 }
 0x2b3   :  { %v3382_v37 = vpop.eup %3381  ;;  %v1230_v8 = vadd.f32 1.0, %v3380_v57  ;;  %3151 = vmatpush3.bf16.msra.mxu0 %v3148_v5 }
 0x2b4   :  { %v1229_v17 = vadd.f32 1.0, %v3382_v37  ;;  %2843 = vmatprep.mubr.f32.mxu0 %v1259_v36  ;;  %3153 = vmatprep.subr.bf16.mxu0 %v3152_v10 }
 0x2b5   :  { %2844 = vmatmul.mubr.f32.gmra.mrb[42].mxu0 %v1260_v19  ;;  %v1262_v59 = vmul.f32 %v1230_v8, %v1134_v14 }
 0x2b6   :  { %v3384_v40 = vpop.eup %3383  ;;  %v1261_v46 = vmul.f32 %v1229_v17, %v1133_v38 }
 0x2b7   :  { %v3386_v45 = vpop.eup %3385  ;;  %v1232_v32 = vadd.f32 1.0, %v3384_v40  ;;  %3155 = vmatpush3.bf16.msra.mxu0 %v3152_v10 }
 0x2b8   :  { %v1231_v47 = vadd.f32 1.0, %v3386_v45  ;;  %2846 = vmatprep.mubr.f32.mxu0 %v1261_v46  ;;  %3157 = vmatprep.subr.bf16.mxu0 %v3156_v12 }
 0x2b9   :  { %2847 = vmatmul.mubr.f32.gmra.mrb[44].mxu0 %v1262_v59  ;;  %v1264_v34 = vmul.f32 %v1232_v32, %v1136_v20 }
 0x2ba   :  { %v1263_v29 = vmul.f32 %v1231_v47, %v1135_v13 }
 0x2bb   :  { %3159 = vmatpush3.bf16.msra.mxu0 %v3156_v12 }
 0x2bc   :  { %2849 = vmatprep.mubr.f32.mxu0 %v1263_v29  ;;  %3161 = vmatprep.subr.bf16.mxu0 %v3160_v60 }
 0x2bd   :  { %2850 = vmatmul.mubr.f32.gmra.mrb[46].mxu0 %v1264_v34 }
 0x2bf   :  { %3163 = vmatpush3.bf16.msra.mxu0 %v3160_v60 }
 0x354   :  { %v2806_v49 = vpop.f32.mrb[16].mxu0 }
 0x355   :  { %v1358_v18 = vadd.f32 %v2806_v49, %v4111_v42  ;;  %v1352_v56 = vpop.f32.mrb[17].mxu0 }
 0x356   :  { %v1353_v2 = vadd.f32 %v1352_v56, %v4111_v42 }
 0x357   :  { %v1544_v25 = vmul.f32 0.70710677, %v1358_v18  ;;  %v1512_v13 = vmul.f32 0.5, %v1358_v18 }
 0x358   :  { %v1543_v15 = vmul.f32 0.70710677, %v1353_v2  ;;  %v2809_v27 = vpop.f32.mrb[18].mxu0  ;;  %v1511_v46 = vmul.f32 0.5, %v1353_v2 }
 0x359   :  { %3387 = verf.f32 %v1544_v25  ;;  %v1368_v48 = vadd.f32 %v2809_v27, %v4111_v42  ;;  %v1362_v26 = vpop.f32.mrb[19].mxu0 }
 0x35a   :  { %3389 = verf.f32 %v1543_v15  ;;  %v1363_v43 = vadd.f32 %v1362_v26, %v4111_v42 }
 0x35b   :  { %v1546_v31 = vmul.f32 0.70710677, %v1368_v48  ;;  %v1514_v39 = vmul.f32 0.5, %v1368_v48 }
 0x35c   :  { %v1545_v28 = vmul.f32 0.70710677, %v1363_v43  ;;  %v2812_v11 = vpop.f32.mrb[20].mxu0  ;;  %v1513_v55 = vmul.f32 0.5, %v1363_v43 }
 0x35d   :  { %3391 = verf.f32 %v1546_v31  ;;  %v1378_v63 = vadd.f32 %v2812_v11, %v4111_v42  ;;  %v1372_v6 = vpop.f32.mrb[21].mxu0 }
 0x35e   :  { %3393 = verf.f32 %v1545_v28  ;;  %v1373_v58 = vadd.f32 %v1372_v6, %v4111_v42 }
 0x35f   :  { %v1548_v24 = vmul.f32 0.70710677, %v1378_v63  ;;  %v1516_v60 = vmul.f32 0.5, %v1378_v63 }
 0x360   :  { %v1547_v30 = vmul.f32 0.70710677, %v1373_v58  ;;  %v2815_v35 = vpop.f32.mrb[22].mxu0  ;;  %v1515_v9 = vmul.f32 0.5, %v1373_v58 }
 0x361   :  { %3395 = verf.f32 %v1548_v24  ;;  %v4120_v57 = vadd.f32 %v2815_v35, %v4111_v42  ;;  %v1382_v36 = vpop.f32.mrb[23].mxu0 }
 0x362   :  { %3397 = verf.f32 %v1547_v30  ;;  %v1383_v37 = vadd.f32 %v1382_v36, %v4111_v42 }
 0x363   :  { %v3388_v8 = vpop.eup %3387  ;;  %v1550_v19 = vmul.f32 0.70710677, %v4120_v57  ;;  %v1518_v11 = vmul.f32 0.5, %v4120_v57 }
 0x364   :  { %v3390_v38 = vpop.eup %3389  ;;  %v1608_v17 = vadd.f32 1.0, %v3388_v8  ;;  %v1549_v14 = vmul.f32 0.70710677, %v1383_v37  ;;  %v2818_v40 = vpop.f32.mrb[24].mxu0  ;;  %v1517_v26 = vmul.f32 0.5, %v1383_v37 }
 0x365   :  { %v1607_v45 = vadd.f32 1.0, %v3390_v38  ;;  %3399 = verf.f32 %v1550_v19  ;;  %v4125_v32 = vadd.f32 %v2818_v40, %v4111_v42  ;;  %v1392_v59 = vpop.f32.mrb[25].mxu0 }
 0x366   :  { %3401 = verf.f32 %v1549_v14  ;;  %v4128_v47 = vadd.f32 %v1392_v59, %v4111_v42  ;;  %v1640_v52 = vmul.f32 %v1608_v17, %v1512_v13 }
 0x367   :  { %v3392_v20 = vpop.eup %3391  ;;  %v1552_v29 = vmul.f32 0.70710677, %v4125_v32  ;;  %v1639_v34 = vmul.f32 %v1607_v45, %v1511_v46  ;;  %v1520_v14 = vmul.f32 0.5, %v4125_v32 }
 0x368   :  { %v3394_v51 = vpop.eup %3393  ;;  %v1610_v53 = vadd.f32 1.0, %v3392_v20  ;;  %v1551_v22 = vmul.f32 0.70710677, %v4128_v47  ;;  %v2821_v54 = vpop.f32.mrb[26].mxu0  ;;  %v1519_v19 = vmul.f32 0.5, %v4128_v47 }
 0x369   :  { %v1609_v21 = vadd.f32 1.0, %v3394_v51  ;;  %3403 = verf.f32 %v1552_v29  ;;  %v4133_v3 = vadd.f32 %v2821_v54, %v4111_v42  ;;  %v1402_v1 = vpop.f32.mrb[27].mxu0  ;;  %2884 = vmatprep.mubr.f32.mxu1 %v1639_v34 }
 0x36a   :  { %3405 = verf.f32 %v1551_v22  ;;  %v4136_v4 = vadd.f32 %v1402_v1, %v4111_v42  ;;  %2885 = vmatmul.mubr.f32.vlgmr.msra.gmra.mrb[48].mxu1 %v1640_v52  ;;  %v1642_v41 = vmul.f32 %v1610_v53, %v1514_v39 }
 0x36b   :  { %v3396_v50 = vpop.eup %3395  ;;  %v1554_v62 = vmul.f32 0.70710677, %v4133_v3  ;;  %v1641_v23 = vmul.f32 %v1609_v21, %v1513_v55  ;;  %v1522_v22 = vmul.f32 0.5, %v4133_v3 }
 0x36c   :  { %v3398_v5 = vpop.eup %3397  ;;  %v1612_v33 = vadd.f32 1.0, %v3396_v50  ;;  %v1553_v7 = vmul.f32 0.70710677, %v4136_v4  ;;  %v2824_v10 = vpop.f32.mrb[28].mxu0  ;;  %v1521_v51 = vmul.f32 0.5, %v4136_v4 }
 0x36d   :  { %v1611_v12 = vadd.f32 1.0, %v3398_v5  ;;  %3407 = verf.f32 %v1554_v62  ;;  %v4141_v0 = vadd.f32 %v2824_v10, %v4111_v42  ;;  %v1412_v16 = vpop.f32.mrb[29].mxu0  ;;  %2887 = vmatprep.mubr.f32.mxu1 %v1641_v23 }
 0x36e   :  { %3409 = verf.f32 %v1553_v7  ;;  %v4144_v44 = vadd.f32 %v1412_v16, %v4111_v42  ;;  %2888 = vmatmul.mubr.f32.gmra.mrb[50].mxu1 %v1642_v41  ;;  %v1644_v48 = vmul.f32 %v1612_v33, %v1516_v60 }
 0x36f   :  { %v3400_v49 = vpop.eup %3399  ;;  %v1556_v18 = vmul.f32 0.70710677, %v4141_v0  ;;  %v1643_v56 = vmul.f32 %v1611_v12, %v1515_v9  ;;  %v1524_v10 = vmul.f32 0.5, %v4141_v0 }
 0x370   :  { %v3402_v2 = vpop.eup %3401  ;;  %v1614_v25 = vadd.f32 1.0, %v3400_v49  ;;  %v1555_v15 = vmul.f32 0.70710677, %v4144_v44  ;;  %v2827_v27 = vpop.f32.mrb[30].mxu0  ;;  %v1523_v5 = vmul.f32 0.5, %v4144_v44 }
 0x371   :  { %v1613_v43 = vadd.f32 1.0, %v3402_v2  ;;  %3411 = verf.f32 %v1556_v18  ;;  %v4149_v31 = vadd.f32 %v2827_v27, %v4111_v42  ;;  %v1422_v28 = vpop.f32.mrb[31].mxu0  ;;  %2890 = vmatprep.mubr.f32.mxu1 %v1643_v56 }
 0x372   :  { %3413 = verf.f32 %v1555_v15  ;;  %v4153_v63 = vadd.f32 %v1422_v28, %v4111_v42  ;;  %2891 = vmatmul.mubr.f32.gmra.mrb[52].mxu1 %v1644_v48  ;;  %v1646_v8 = vmul.f32 %v1614_v25, %v1518_v11 }
 0x373   :  { %v3404_v6 = vpop.eup %3403  ;;  %v1558_v58 = vmul.f32 0.70710677, %v4149_v31  ;;  %v1645_v24 = vmul.f32 %v1613_v43, %v1517_v26  ;;  %v1526_v27 = vmul.f32 0.5, %v4149_v31 }
 0x374   :  { %v3406_v30 = vpop.eup %3405  ;;  %v1616_v35 = vadd.f32 1.0, %v3404_v6  ;;  %v1557_v36 = vmul.f32 0.70710677, %v4153_v63  ;;  %v2830_v37 = vpop.f32.mrb[32].mxu0  ;;  %v1525_v2 = vmul.f32 0.5, %v4153_v63 }
 0x375   :  { %v1615_v38 = vadd.f32 1.0, %v3406_v30  ;;  %3415 = verf.f32 %v1558_v58  ;;  %v4159_v57 = vadd.f32 %v2830_v37, %v4111_v42  ;;  %v1432_v17 = vpop.f32.mrb[33].mxu0  ;;  %2893 = vmatprep.mubr.f32.mxu1 %v1645_v24 }
 0x376   :  { %3417 = verf.f32 %v1557_v36  ;;  %v4163_v40 = vadd.f32 %v1432_v17, %v4111_v42  ;;  %2894 = vmatmul.mubr.f32.gmra.mrb[54].mxu1 %v1646_v8  ;;  %v1648_v34 = vmul.f32 %v1616_v35, %v1520_v14 }
 0x377   :  { %v3408_v46 = vpop.eup %3407  ;;  %v1560_v45 = vmul.f32 0.70710677, %v4159_v57  ;;  %v1647_v59 = vmul.f32 %v1615_v38, %v1519_v19  ;;  %v1528_v37 = vmul.f32 0.5, %v4159_v57 }
 0x378   :  { %v3410_v13 = vpop.eup %3409  ;;  %v1618_v47 = vadd.f32 1.0, %v3408_v46  ;;  %v1559_v20 = vmul.f32 0.70710677, %v4163_v40  ;;  %v2833_v29 = vpop.f32.mrb[34].mxu0  ;;  %v1527_v30 = vmul.f32 0.5, %v4163_v40 }
 0x379   :  { %v1617_v52 = vadd.f32 1.0, %v3410_v13  ;;  %3419 = verf.f32 %v1560_v45  ;;  %v4169_v32 = vadd.f32 %v2833_v29, %v4111_v42  ;;  %v1442_v53 = vpop.f32.mrb[35].mxu0  ;;  %2896 = vmatprep.mubr.f32.mxu1 %v1647_v59 }
 0x37a   :  { %3421 = verf.f32 %v1559_v20  ;;  %v4173_v54 = vadd.f32 %v1442_v53, %v4111_v42  ;;  %2897 = vmatmul.mubr.f32.gmra.mrb[56].mxu1 %v1648_v34  ;;  %v1650_v23 = vmul.f32 %v1618_v47, %v1522_v22 }
 0x37b   :  { %v3412_v55 = vpop.eup %3411  ;;  %v1562_v21 = vmul.f32 0.70710677, %v4169_v32  ;;  %v1649_v1 = vmul.f32 %v1617_v52, %v1521_v51  ;;  %v1530_v29 = vmul.f32 0.5, %v4169_v32 }
 0x37c   :  { %v3414_v39 = vpop.eup %3413  ;;  %v1620_v4 = vadd.f32 1.0, %v3412_v55  ;;  %v1561_v50 = vmul.f32 0.70710677, %v4173_v54  ;;  %v2836_v62 = vpop.f32.mrb[36].mxu0  ;;  %v1529_v13 = vmul.f32 0.5, %v4173_v54 }
 0x37d   :  { %v1619_v33 = vadd.f32 1.0, %v3414_v39  ;;  %3423 = verf.f32 %v1562_v21  ;;  %v4179_v3 = vadd.f32 %v2836_v62, %v4111_v42  ;;  %v1452_v7 = vpop.f32.mrb[37].mxu0  ;;  %2899 = vmatprep.mubr.f32.mxu1 %v1649_v1 }
 0x37e   :  { %3425 = verf.f32 %v1561_v50  ;;  %v4183_v41 = vadd.f32 %v1452_v7, %v4111_v42  ;;  %2900 = vmatmul.mubr.f32.gmra.mrb[58].mxu1 %v1650_v23  ;;  %v1652_v56 = vmul.f32 %v1620_v4, %v1524_v10 }
 0x37f   :  { %v3416_v9 = vpop.eup %3415  ;;  %v1564_v12 = vmul.f32 0.70710677, %v4179_v3  ;;  %v1651_v16 = vmul.f32 %v1619_v33, %v1523_v5  ;;  %v1532_v62 = vmul.f32 0.5, %v4179_v3 }
 0x380   :  { %v3418_v60 = vpop.eup %3417  ;;  %v1622_v44 = vadd.f32 1.0, %v3416_v9  ;;  %v1563_v49 = vmul.f32 0.70710677, %v4183_v41  ;;  %v2839_v18 = vpop.f32.mrb[38].mxu0  ;;  %v1531_v39 = vmul.f32 0.5, %v4183_v41 }
 0x381   :  { %v1621_v25 = vadd.f32 1.0, %v3418_v60  ;;  %3427 = verf.f32 %v1564_v12  ;;  %v4189_v0 = vadd.f32 %v2839_v18, %v4111_v42  ;;  %v1462_v15 = vpop.f32.mrb[39].mxu0  ;;  %2902 = vmatprep.mubr.f32.mxu1 %v1651_v16 }
 0x382   :  { %3429 = verf.f32 %v1563_v49  ;;  %v4193_v48 = vadd.f32 %v1462_v15, %v4111_v42  ;;  %2903 = vmatmul.mubr.f32.gmra.mrb[60].mxu1 %v1652_v56  ;;  %v1654_v24 = vmul.f32 %v1622_v44, %v1526_v27 }
 0x383   :  { %v3420_v26 = vpop.eup %3419  ;;  %v1566_v43 = vmul.f32 0.70710677, %v4189_v0  ;;  %v1653_v28 = vmul.f32 %v1621_v25, %v1525_v2  ;;  %v1534_v3 = vmul.f32 0.5, %v4189_v0 }
 0x384   :  { %v3422_v11 = vpop.eup %3421  ;;  %v1624_v63 = vadd.f32 1.0, %v3420_v26  ;;  %v1565_v6 = vmul.f32 0.70710677, %v4193_v48  ;;  %v2842_v58 = vpop.f32.mrb[40].mxu0  ;;  %v1533_v60 = vmul.f32 0.5, %v4193_v48 }
 0x385   :  { %v1623_v35 = vadd.f32 1.0, %v3422_v11  ;;  %3431 = verf.f32 %v1566_v43  ;;  %v4199_v31 = vadd.f32 %v2842_v58, %v4111_v42  ;;  %v1472_v36 = vpop.f32.mrb[41].mxu0  ;;  %2905 = vmatprep.mubr.f32.mxu1 %v1653_v28 }
 0x386   :  { %3433 = verf.f32 %v1565_v6  ;;  %v4203_v8 = vadd.f32 %v1472_v36, %v4111_v42  ;;  %2906 = vmatmul.mubr.f32.gmra.mrb[62].mxu1 %v1654_v24  ;;  %v1656_v59 = vmul.f32 %v1624_v63, %v1528_v37 }
 0x387   :  { %v3424_v19 = vpop.eup %3423  ;;  %v1568_v38 = vmul.f32 0.70710677, %v4199_v31  ;;  %v1655_v17 = vmul.f32 %v1623_v35, %v1527_v30  ;;  %v1536_v63 = vmul.f32 0.5, %v4199_v31 }
 0x388   :  { %v3426_v14 = vpop.eup %3425  ;;  %v1626_v40 = vadd.f32 1.0, %v3424_v19  ;;  %v1567_v46 = vmul.f32 0.70710677, %v4203_v8  ;;  %v2845_v45 = vpop.f32.mrb[42].mxu0  ;;  %v1535_v48 = vmul.f32 0.5, %v4203_v8 }
 0x389   :  { %v1625_v47 = vadd.f32 1.0, %v3426_v14  ;;  %3435 = verf.f32 %v1568_v38  ;;  %v4209_v57 = vadd.f32 %v2845_v45, %v4111_v42  ;;  %v1482_v20 = vpop.f32.mrb[43].mxu0  ;;  %2908 = vmatprep.mubr.f32.mxu1 %v1655_v17 }
 0x38a   :  { %3437 = verf.f32 %v1567_v46  ;;  %v1483_v34 = vadd.f32 %v1482_v20, %v4111_v42  ;;  %2909 = vmatmul.mubr.f32.gmra.mrb[64].mxu1 %v1656_v59  ;;  %v1658_v1 = vmul.f32 %v1626_v40, %v1530_v29 }
 0x38b   :  { %v3428_v51 = vpop.eup %3427  ;;  %v1570_v52 = vmul.f32 0.70710677, %v4209_v57  ;;  %v1657_v53 = vmul.f32 %v1625_v47, %v1529_v13  ;;  %v1538_v36 = vmul.f32 0.5, %v4209_v57 }
 0x38c   :  { %v3430_v22 = vpop.eup %3429  ;;  %v1628_v55 = vadd.f32 1.0, %v3428_v51  ;;  %v1569_v54 = vmul.f32 0.70710677, %v1483_v34  ;;  %v2848_v21 = vpop.f32.mrb[44].mxu0  ;;  %v1537_v30 = vmul.f32 0.5, %v1483_v34 }
 0x38d   :  { %v1627_v4 = vadd.f32 1.0, %v3430_v22  ;;  %3439 = verf.f32 %v1570_v52  ;;  %v1498_v50 = vadd.f32 %v2848_v21, %v4111_v42  ;;  %v1492_v32 = vpop.f32.mrb[45].mxu0  ;;  %2911 = vmatprep.mubr.f32.mxu1 %v1657_v53  ;;  %v2090_v52 = vld [vmem:[#allocation2 + $0x260] sm:$0xff]  ;;  %v2091_v53 = vld [vmem:[#allocation2 + $0x268] sm:$0xff] }
 0x38e   :  { %3441 = verf.f32 %v1569_v54  ;;  %v1493_v23 = vadd.f32 %v1492_v32, %v4111_v42  ;;  %2912 = vmatmul.mubr.f32.gmra.mrb[66].mxu1 %v1658_v1  ;;  %v1660_v41 = vmul.f32 %v1628_v55, %v1532_v62  ;;  %v3164_v22 = vpack.c.bf16 %v2091_v53, %v2090_v52  ;;  %v2092_v55 = vld [vmem:[#allocation2 + $0x270] sm:$0xff]  ;;  %v2093_v54 = vld [vmem:[#allocation2 + $0x278] sm:$0xff] }
 0x38f   :  { %v3432_v5 = vpop.eup %3431  ;;  %v1572_v33 = vmul.f32 0.70710677, %v1498_v50  ;;  %v1659_v7 = vmul.f32 %v1627_v4, %v1531_v39  ;;  %v1540_v40 = vmul.f32 0.5, %v1498_v50  ;;  %v3168_v21 = vpack.c.bf16 %v2093_v54, %v2092_v55  ;;  %v4229_v39 = vld [vmem:[%s4399_s2] sm:$0xff]  ;;  %s3569_s2 = smov [#allocation5]  }
 0x390   :  { %v3434_v10 = vpop.eup %3433  ;;  %v1630_v9 = vadd.f32 1.0, %v3432_v5  ;;  %v1571_v12 = vmul.f32 0.70710677, %v1493_v23  ;;  %v2851_v16 = vpop.f32.mrb[46].mxu0  ;;  %v1539_v14 = vmul.f32 0.5, %v1493_v23  ;;  %3165 = vmatprep.subr.bf16.mxu0 %v3164_v22  ;;  %v1690_v1 = vsub.s32 5, %v3704_v61 }
 0x391   :  { %v1629_v44 = vadd.f32 1.0, %v3434_v10  ;;  %3443 = verf.f32 %v1572_v33  ;;  %v1508_v49 = vadd.f32 %v2851_v16, %v4111_v42  ;;  %v1502_v18 = vpop.f32.mrb[47].mxu0  ;;  %2914 = vmatprep.mubr.f32.mxu1 %v1659_v7  ;;  %3167 = vmatpush3.bf16.msra.mxu0 %v3164_v22  ;;  %s2360_s15 = sshll.u32 %s3569_s2, 4  ;;  %s2361_s15 = int_to_ptr.vmem [resolvable:$true] %s2360_s15 }
 0x392   :  { %3445 = verf.f32 %v1571_v12  ;;  %v1503_v56 = vadd.f32 %v1502_v18, %v4111_v42  ;;  %2915 = vmatmul.mubr.f32.gmra.mrb[68].mxu1 %v1660_v41  ;;  %v1662_v28 = vmul.f32 %v1630_v9, %v1534_v3  ;;  %3169 = vmatprep.subr.bf16.mxu0 %v3168_v21  ;;  %v4232_v4 = vrot.slane %v4229_v39, %v1690_v1  ;;  %s3539_s16 = scalar_lea.vmem %s2361_s15, 4096  ;;  %p3544_p9 = scmp.lt.s32.totalorder %s2361_s15, %s2361_s15 }
 0x393   :  { %v3436_v2 = vpop.eup %3435  ;;  %v1574_v25 = vmul.f32 0.70710677, %v1508_v49  ;;  %v1661_v15 = vmul.f32 %v1629_v44, %v1533_v60  ;;  %v1542_v57 = vmul.f32 0.5, %v1508_v49  ;;  %p3540_p8 = scmp.ne.s32.totalorder %s2361_s15, %s3539_s16  ;;  %p3545_p10 = scmp.lt.s32.totalorder %s3539_s16, %s3539_s16 }
 0x394   :  { %v3438_v27 = vpop.eup %3437  ;;  %v1632_v26 = vadd.f32 1.0, %v3436_v2  ;;  %v1573_v43 = vmul.f32 0.70710677, %v1503_v56  ;;  %v1541_v20 = vmul.f32 0.5, %v1503_v56 }
 0x395   :  { %v1631_v11 = vadd.f32 1.0, %v3438_v27  ;;  %3447 = verf.f32 %v1574_v25  ;;  %2917 = vmatprep.mubr.f32.mxu1 %v1661_v15  ;;  %3171 = vmatpush3.bf16.msra.mxu0 %v3168_v21  ;;  %p3546_p11 = por %p3545_p10, %p3544_p9 }
 0x396   :  { %3449 = verf.f32 %v1573_v43  ;;  %2918 = vmatmul.mubr.f32.gmra.mrb[70].mxu1 %v1662_v28  ;;  %v1664_v24 = vmul.f32 %v1632_v26, %v1536_v63 }
 0x397   :  { %v3440_v0 = vpop.eup %3439  ;;  %v1663_v6 = vmul.f32 %v1631_v11, %v1535_v48  ;;  %p3547_p12 = pnand %p3546_p11, %p3540_p8 }
 0x398   :  { %v3442_v42 = vpop.eup %3441  ;;  %v1634_v58 = vadd.f32 1.0, %v3440_v0 }
 0x399   :  { %v1633_v35 = vadd.f32 1.0, %v3442_v42  ;;  %2920 = vmatprep.mubr.f32.mxu1 %v1663_v6 }
 0x39a   :  { %2921 = vmatmul.mubr.f32.gmra.mrb[72].mxu1 %v1664_v24  ;;  %v1666_v17 = vmul.f32 %v1634_v58, %v1538_v36 }
 0x39b   :  { %v3444_v37 = vpop.eup %3443  ;;  %v1665_v8 = vmul.f32 %v1633_v35, %v1537_v30 }
 0x39c   :  { %v3446_v19 = vpop.eup %3445  ;;  %v1636_v38 = vadd.f32 1.0, %v3444_v37 }
 0x39d   :  { %v1635_v31 = vadd.f32 1.0, %v3446_v19  ;;  %2923 = vmatprep.mubr.f32.mxu1 %v1665_v8 }
 0x39e   :  { %2924 = vmatmul.mubr.f32.gmra.mrb[74].mxu1 %v1666_v17  ;;  %v1668_v47 = vmul.f32 %v1636_v38, %v1540_v40 }
 0x39f   :  { %v3448_v46 = vpop.eup %3447  ;;  %v1667_v45 = vmul.f32 %v1635_v31, %v1539_v14 }
 0x3a0   :  { %v3450_v59 = vpop.eup %3449  ;;  %v1638_v13 = vadd.f32 1.0, %v3448_v46 }
 0x3a1   :  { %v1637_v29 = vadd.f32 1.0, %v3450_v59  ;;  %2926 = vmatprep.mubr.f32.mxu1 %v1667_v45 }
 0x3a2   :  { %2927 = vmatmul.mubr.f32.gmra.mrb[76].mxu1 %v1668_v47  ;;  %v1670_v51 = vmul.f32 %v1638_v13, %v1542_v57 }
 0x3a3   :  { %v1669_v34 = vmul.f32 %v1637_v29, %v1541_v20 }
 0x3a5   :  { %2929 = vmatprep.mubr.f32.mxu1 %v1669_v34 }
 0x3a6   :  { %2930 = vmatmul.mubr.f32.gmra.mrb[78].mxu1 %v1670_v51 }
 0x43d   :  { %v2886_v50 = vpop.f32.mrb[48].mxu1 }
 0x43e   :  { %v1764_v32 = vadd.f32 %v2886_v50, %v4232_v4  ;;  %v1758_v62 = vpop.f32.mrb[49].mxu1 }
 0x43f   :  { %v1759_v23 = vadd.f32 %v1758_v62, %v4232_v4 }
 0x440   :  { %v1950_v5 = vmul.f32 0.70710677, %v1764_v32  ;;  %v1918_v24 = vmul.f32 0.5, %v1764_v32 }
 0x441   :  { %v1949_v33 = vmul.f32 0.70710677, %v1759_v23  ;;  %v2889_v7 = vpop.f32.mrb[50].mxu1  ;;  %v1917_v0 = vmul.f32 0.5, %v1759_v23 }
 0x442   :  { %3451 = verf.f32 %v1950_v5  ;;  %v1774_v10 = vadd.f32 %v2889_v7, %v4232_v4  ;;  %v1768_v9 = vpop.f32.mrb[51].mxu1 }
 0x443   :  { %3453 = verf.f32 %v1949_v33  ;;  %v1769_v12 = vadd.f32 %v1768_v9, %v4232_v4 }
 0x444   :  { %v1952_v16 = vmul.f32 0.70710677, %v1774_v10  ;;  %v1920_v59 = vmul.f32 0.5, %v1774_v10 }
 0x445   :  { %v1951_v41 = vmul.f32 0.70710677, %v1769_v12  ;;  %v2892_v60 = vpop.f32.mrb[52].mxu1  ;;  %v1919_v31 = vmul.f32 0.5, %v1769_v12 }
 0x446   :  { %3455 = verf.f32 %v1952_v16  ;;  %v1784_v44 = vadd.f32 %v2892_v60, %v4232_v4  ;;  %v1778_v49 = vpop.f32.mrb[53].mxu1 }
 0x447   :  { %3457 = verf.f32 %v1951_v41  ;;  %v1779_v18 = vadd.f32 %v1778_v49, %v4232_v4 }
 0x448   :  { %v1954_v3 = vmul.f32 0.70710677, %v1784_v44  ;;  %v1922_v1 = vmul.f32 0.5, %v1784_v44 }
 0x449   :  { %v1953_v56 = vmul.f32 0.70710677, %v1779_v18  ;;  %v2895_v2 = vpop.f32.mrb[54].mxu1  ;;  %v1921_v22 = vmul.f32 0.5, %v1779_v18 }
 0x44a   :  { %3459 = verf.f32 %v1954_v3  ;;  %v4241_v25 = vadd.f32 %v2895_v2, %v4232_v4  ;;  %v1788_v15 = vpop.f32.mrb[55].mxu1 }
 0x44b   :  { %3461 = verf.f32 %v1953_v56  ;;  %v1789_v27 = vadd.f32 %v1788_v15, %v4232_v4 }
 0x44c   :  { %v3452_v26 = vpop.eup %3451  ;;  %v1956_v43 = vmul.f32 0.70710677, %v4241_v25  ;;  %v1924_v44 = vmul.f32 0.5, %v4241_v25 }
 0x44d   :  { %v3454_v28 = vpop.eup %3453  ;;  %v2014_v48 = vadd.f32 1.0, %v3452_v26  ;;  %v1955_v11 = vmul.f32 0.70710677, %v1789_v27  ;;  %v2898_v63 = vpop.f32.mrb[56].mxu1  ;;  %v1923_v12 = vmul.f32 0.5, %v1789_v27 }
 0x44e   :  { %v2013_v6 = vadd.f32 1.0, %v3454_v28  ;;  %3463 = verf.f32 %v1956_v43  ;;  %v4246_v42 = vadd.f32 %v2898_v63, %v4232_v4  ;;  %v1798_v58 = vpop.f32.mrb[57].mxu1 }
 0x44f   :  { %3465 = verf.f32 %v1955_v11  ;;  %v4249_v30 = vadd.f32 %v1798_v58, %v4232_v4  ;;  %v2046_v19 = vmul.f32 %v2014_v48, %v1918_v24 }
 0x450   :  { %v3456_v35 = vpop.eup %3455  ;;  %v1958_v36 = vmul.f32 0.70710677, %v4246_v42  ;;  %v2045_v37 = vmul.f32 %v2013_v6, %v1917_v0  ;;  %v1926_v63 = vmul.f32 0.5, %v4246_v42 }
 0x451   :  { %v3458_v8 = vpop.eup %3457  ;;  %v2016_v38 = vadd.f32 1.0, %v3456_v35  ;;  %v1957_v17 = vmul.f32 0.70710677, %v4249_v30  ;;  %v2901_v14 = vpop.f32.mrb[58].mxu1  ;;  %v1925_v28 = vmul.f32 0.5, %v4249_v30 }
 0x452   :  { %v2015_v40 = vadd.f32 1.0, %v3458_v8  ;;  %3467 = verf.f32 %v1958_v36  ;;  %v4254_v46 = vadd.f32 %v2901_v14, %v4232_v4  ;;  %v1808_v45 = vpop.f32.mrb[59].mxu1  ;;  %2964 = vmatprep.mubr.f32.mxu0 %v2045_v37 }
 0x453   :  { %3469 = verf.f32 %v1957_v17  ;;  %v4257_v13 = vadd.f32 %v1808_v45, %v4232_v4  ;;  %2965 = vmatmul.mubr.f32.vlgmr.msra.gmra.mrb[48].mxu0 %v2046_v19  ;;  %v2048_v53 = vmul.f32 %v2016_v38, %v1920_v59 }
 0x454   :  { %v3460_v47 = vpop.eup %3459  ;;  %v1960_v20 = vmul.f32 0.70710677, %v4254_v46  ;;  %v2047_v29 = vmul.f32 %v2015_v40, %v1919_v31  ;;  %v1928_v14 = vmul.f32 0.5, %v4254_v46 }
 0x455   :  { %v3462_v57 = vpop.eup %3461  ;;  %v2018_v34 = vadd.f32 1.0, %v3460_v47  ;;  %v1959_v51 = vmul.f32 0.70710677, %v4257_v13  ;;  %v2904_v52 = vpop.f32.mrb[60].mxu1  ;;  %v1927_v19 = vmul.f32 0.5, %v4257_v13 }
 0x456   :  { %v2017_v55 = vadd.f32 1.0, %v3462_v57  ;;  %3471 = verf.f32 %v1960_v20  ;;  %v4262_v54 = vadd.f32 %v2904_v52, %v4232_v4  ;;  %v1818_v21 = vpop.f32.mrb[61].mxu1  ;;  %2967 = vmatprep.mubr.f32.mxu0 %v2047_v29 }
 0x457   :  { %3473 = verf.f32 %v1959_v51  ;;  %v4265_v50 = vadd.f32 %v1818_v21, %v4232_v4  ;;  %2968 = vmatmul.mubr.f32.gmra.mrb[50].mxu0 %v2048_v53  ;;  %v2050_v9 = vmul.f32 %v2018_v34, %v1922_v1 }
 0x458   :  { %v3464_v32 = vpop.eup %3463  ;;  %v1962_v62 = vmul.f32 0.70710677, %v4262_v54  ;;  %v2049_v23 = vmul.f32 %v2017_v55, %v1921_v22  ;;  %v1930_v53 = vmul.f32 0.5, %v4262_v54 }
 0x459   :  { %v3466_v5 = vpop.eup %3465  ;;  %v2020_v33 = vadd.f32 1.0, %v3464_v32  ;;  %v1961_v7 = vmul.f32 0.70710677, %v4265_v50  ;;  %v2907_v10 = vpop.f32.mrb[62].mxu1  ;;  %v1929_v34 = vmul.f32 0.5, %v4265_v50 }
 0x45a   :  { %v2019_v16 = vadd.f32 1.0, %v3466_v5  ;;  %3475 = verf.f32 %v1962_v62  ;;  %v4270_v41 = vadd.f32 %v2907_v10, %v4232_v4  ;;  %v1828_v60 = vpop.f32.mrb[63].mxu1  ;;  %2970 = vmatprep.mubr.f32.mxu0 %v2049_v23 }
 0x45b   :  { %3477 = verf.f32 %v1961_v7  ;;  %v4274_v49 = vadd.f32 %v1828_v60, %v4232_v4  ;;  %2971 = vmatmul.mubr.f32.gmra.mrb[52].mxu0 %v2050_v9  ;;  %v2052_v43 = vmul.f32 %v2020_v33, %v1924_v44 }
 0x45c   :  { %v3468_v18 = vpop.eup %3467  ;;  %v1964_v3 = vmul.f32 0.70710677, %v4270_v41  ;;  %v2051_v56 = vmul.f32 %v2019_v16, %v1923_v12  ;;  %v1932_v9 = vmul.f32 0.5, %v4270_v41 }
 0x45d   :  { %v3470_v2 = vpop.eup %3469  ;;  %v2022_v15 = vadd.f32 1.0, %v3468_v18  ;;  %v1963_v27 = vmul.f32 0.70710677, %v4274_v49  ;;  %v2910_v26 = vpop.f32.mrb[64].mxu1  ;;  %v1931_v33 = vmul.f32 0.5, %v4274_v49 }
 0x45e   :  { %v2021_v48 = vadd.f32 1.0, %v3470_v2  ;;  %3479 = verf.f32 %v1964_v3  ;;  %v4280_v25 = vadd.f32 %v2910_v26, %v4232_v4  ;;  %v1838_v11 = vpop.f32.mrb[65].mxu1  ;;  %2973 = vmatprep.mubr.f32.mxu0 %v2051_v56 }
 0x45f   :  { %3481 = verf.f32 %v1963_v27  ;;  %v4284_v0 = vadd.f32 %v1838_v11, %v4232_v4  ;;  %2974 = vmatmul.mubr.f32.gmra.mrb[54].mxu0 %v2052_v43  ;;  %v2054_v8 = vmul.f32 %v2022_v15, %v1926_v63 }
 0x460   :  { %v3472_v6 = vpop.eup %3471  ;;  %v1966_v58 = vmul.f32 0.70710677, %v4280_v25  ;;  %v2053_v24 = vmul.f32 %v2021_v48, %v1925_v28  ;;  %v1934_v43 = vmul.f32 0.5, %v4280_v25 }
 0x461   :  { %v3474_v35 = vpop.eup %3473  ;;  %v2024_v30 = vadd.f32 1.0, %v3472_v6  ;;  %v1965_v36 = vmul.f32 0.70710677, %v4284_v0  ;;  %v2913_v37 = vpop.f32.mrb[66].mxu1  ;;  %v1933_v15 = vmul.f32 0.5, %v4284_v0 }
 0x462   :  { %v2023_v38 = vadd.f32 1.0, %v3474_v35  ;;  %3483 = verf.f32 %v1966_v58  ;;  %v4290_v42 = vadd.f32 %v2913_v37, %v4232_v4  ;;  %v1848_v17 = vpop.f32.mrb[67].mxu1  ;;  %2976 = vmatprep.mubr.f32.mxu0 %v2053_v24 }
 0x463   :  { %3485 = verf.f32 %v1965_v36  ;;  %v4294_v31 = vadd.f32 %v1848_v17, %v4232_v4  ;;  %2977 = vmatmul.mubr.f32.gmra.mrb[56].mxu0 %v2054_v8  ;;  %v2056_v57 = vmul.f32 %v2024_v30, %v1928_v14 }
 0x464   :  { %v3476_v40 = vpop.eup %3475  ;;  %v1968_v45 = vmul.f32 0.70710677, %v4290_v42  ;;  %v2055_v59 = vmul.f32 %v2023_v38, %v1927_v19  ;;  %v1936_v8 = vmul.f32 0.5, %v4290_v42 }
 0x465   :  { %v3478_v47 = vpop.eup %3477  ;;  %v2026_v13 = vadd.f32 1.0, %v3476_v40  ;;  %v1967_v20 = vmul.f32 0.70710677, %v4294_v31  ;;  %v2916_v29 = vpop.f32.mrb[68].mxu1  ;;  %v1935_v30 = vmul.f32 0.5, %v4294_v31 }
 0x466   :  { %v2025_v51 = vadd.f32 1.0, %v3478_v47  ;;  %3487 = verf.f32 %v1968_v45  ;;  %v4300_v46 = vadd.f32 %v2916_v29, %v4232_v4  ;;  %v1858_v52 = vpop.f32.mrb[69].mxu1  ;;  %2979 = vmatprep.mubr.f32.mxu0 %v2055_v59 }
 0x467   :  { %3489 = verf.f32 %v1967_v20  ;;  %v4304_v22 = vadd.f32 %v1858_v52, %v4232_v4  ;;  %2980 = vmatmul.mubr.f32.gmra.mrb[58].mxu0 %v2056_v57  ;;  %v2058_v5 = vmul.f32 %v2026_v13, %v1930_v53 }
 0x468   :  { %v3480_v55 = vpop.eup %3479  ;;  %v1970_v21 = vmul.f32 0.70710677, %v4300_v46  ;;  %v2057_v1 = vmul.f32 %v2025_v51, %v1929_v34  ;;  %v1938_v57 = vmul.f32 0.5, %v4300_v46 }
 0x469   :  { %v3482_v32 = vpop.eup %3481  ;;  %v2028_v50 = vadd.f32 1.0, %v3480_v55  ;;  %v1969_v62 = vmul.f32 0.70710677, %v4304_v22  ;;  %v2919_v23 = vpop.f32.mrb[70].mxu1  ;;  %v1937_v13 = vmul.f32 0.5, %v4304_v22 }
 0x46a   :  { %v2027_v7 = vadd.f32 1.0, %v3482_v32  ;;  %3491 = verf.f32 %v1970_v21  ;;  %v4310_v54 = vadd.f32 %v2919_v23, %v4232_v4  ;;  %v1868_v10 = vpop.f32.mrb[71].mxu1  ;;  %2982 = vmatprep.mubr.f32.mxu0 %v2057_v1 }
 0x46b   :  { %3493 = verf.f32 %v1969_v62  ;;  %v4314_v12 = vadd.f32 %v1868_v10, %v4232_v4  ;;  %2983 = vmatmul.mubr.f32.gmra.mrb[60].mxu0 %v2058_v5  ;;  %v2060_v2 = vmul.f32 %v2028_v50, %v1932_v9 }
 0x46c   :  { %v3484_v16 = vpop.eup %3483  ;;  %v1972_v60 = vmul.f32 0.70710677, %v4310_v54  ;;  %v2059_v44 = vmul.f32 %v2027_v7, %v1931_v33  ;;  %v1940_v46 = vmul.f32 0.5, %v4310_v54 }
 0x46d   :  { %v3486_v18 = vpop.eup %3485  ;;  %v2030_v49 = vadd.f32 1.0, %v3484_v16  ;;  %v1971_v3 = vmul.f32 0.70710677, %v4314_v12  ;;  %v2922_v56 = vpop.f32.mrb[72].mxu1  ;;  %v1939_v50 = vmul.f32 0.5, %v4314_v12 }
 0x46e   :  { %v2029_v27 = vadd.f32 1.0, %v3486_v18  ;;  %3495 = verf.f32 %v1972_v60  ;;  %v4320_v41 = vadd.f32 %v2922_v56, %v4232_v4  ;;  %v1878_v26 = vpop.f32.mrb[73].mxu1  ;;  %2985 = vmatprep.mubr.f32.mxu0 %v2059_v44 }
 0x46f   :  { %3497 = verf.f32 %v1971_v3  ;;  %v4324_v28 = vadd.f32 %v1878_v26, %v4232_v4  ;;  %2986 = vmatmul.mubr.f32.gmra.mrb[62].mxu0 %v2060_v2  ;;  %v2062_v35 = vmul.f32 %v2030_v49, %v1934_v43 }
 0x470   :  { %v3488_v48 = vpop.eup %3487  ;;  %v1974_v11 = vmul.f32 0.70710677, %v4320_v41  ;;  %v2061_v63 = vmul.f32 %v2029_v27, %v1933_v15  ;;  %v1942_v3 = vmul.f32 0.5, %v4320_v41 }
 0x471   :  { %v3490_v6 = vpop.eup %3489  ;;  %v2032_v0 = vadd.f32 1.0, %v3488_v48  ;;  %v1973_v58 = vmul.f32 0.70710677, %v4324_v28  ;;  %v2925_v24 = vpop.f32.mrb[74].mxu1  ;;  %v1941_v12 = vmul.f32 0.5, %v4324_v28 }
 0x472   :  { %v2031_v36 = vadd.f32 1.0, %v3490_v6  ;;  %3499 = verf.f32 %v1974_v11  ;;  %v4330_v25 = vadd.f32 %v2925_v24, %v4232_v4  ;;  %v1888_v37 = vpop.f32.mrb[75].mxu1  ;;  %2988 = vmatprep.mubr.f32.mxu0 %v2061_v63 }
 0x473   :  { %3501 = verf.f32 %v1973_v58  ;;  %v1889_v19 = vadd.f32 %v1888_v37, %v4232_v4  ;;  %2989 = vmatmul.mubr.f32.gmra.mrb[64].mxu0 %v2062_v35  ;;  %v2064_v47 = vmul.f32 %v2032_v0, %v1936_v8 }
 0x474   :  { %v3492_v38 = vpop.eup %3491  ;;  %v1976_v17 = vmul.f32 0.70710677, %v4330_v25  ;;  %v2063_v14 = vmul.f32 %v2031_v36, %v1935_v30  ;;  %v1944_v43 = vmul.f32 0.5, %v4330_v25 }
 0x475   :  { %v3494_v40 = vpop.eup %3493  ;;  %v2034_v45 = vadd.f32 1.0, %v3492_v38  ;;  %v1975_v31 = vmul.f32 0.70710677, %v1889_v19  ;;  %v2928_v59 = vpop.f32.mrb[76].mxu1  ;;  %v1943_v27 = vmul.f32 0.5, %v1889_v19 }
 0x476   :  { %v2033_v20 = vadd.f32 1.0, %v3494_v40  ;;  %3503 = verf.f32 %v1976_v17  ;;  %v1904_v29 = vadd.f32 %v2928_v59, %v4232_v4  ;;  %v1898_v42 = vpop.f32.mrb[77].mxu1  ;;  %2991 = vmatprep.mubr.f32.mxu0 %v2063_v14  ;;  %v2096_v14 = vsub.s32 6, %v3704_v61 }
 0x477   :  { %3505 = verf.f32 %v1975_v31  ;;  %v1899_v34 = vadd.f32 %v1898_v42, %v4232_v4  ;;  %2992 = vmatmul.mubr.f32.gmra.mrb[66].mxu0 %v2064_v47  ;;  %v2066_v22 = vmul.f32 %v2034_v45, %v1938_v57 }
 0x478   :  { %v3496_v51 = vpop.eup %3495  ;;  %v1978_v52 = vmul.f32 0.70710677, %v1904_v29  ;;  %v2065_v53 = vmul.f32 %v2033_v20, %v1937_v13  ;;  %v1946_v58 = vmul.f32 0.5, %v1904_v29  ;;  %v4348_v40 = vrot.slane %v4229_v39, %v2096_v14 }
 0x479   :  { %v3498_v55 = vpop.eup %3497  ;;  %v2036_v21 = vadd.f32 1.0, %v3496_v51  ;;  %v1977_v1 = vmul.f32 0.70710677, %v1899_v34  ;;  %v2931_v32 = vpop.f32.mrb[78].mxu1  ;;  %v1945_v0 = vmul.f32 0.5, %v1899_v34 }
 0x47a   :  { %v2035_v62 = vadd.f32 1.0, %v3498_v55  ;;  %3507 = verf.f32 %v1978_v52  ;;  %v1914_v23 = vadd.f32 %v2931_v32, %v4232_v4  ;;  %v1908_v5 = vpop.f32.mrb[79].mxu1  ;;  %2994 = vmatprep.mubr.f32.mxu0 %v2065_v53 }
 0x47b   :  { %3509 = verf.f32 %v1977_v1  ;;  %v1909_v33 = vadd.f32 %v1908_v5, %v4232_v4  ;;  %2995 = vmatmul.mubr.f32.gmra.mrb[68].mxu0 %v2066_v22  ;;  %v2068_v18 = vmul.f32 %v2036_v21, %v1940_v46 }
 0x47c   :  { %v3500_v7 = vpop.eup %3499  ;;  %v1980_v10 = vmul.f32 0.70710677, %v1914_v23  ;;  %v2067_v9 = vmul.f32 %v2035_v62, %v1939_v50  ;;  %v1948_v25 = vmul.f32 0.5, %v1914_v23 }
 0x47d   :  { %v3502_v16 = vpop.eup %3501  ;;  %v2038_v60 = vadd.f32 1.0, %v3500_v7  ;;  %v1979_v44 = vmul.f32 0.70710677, %v1909_v33  ;;  %v1947_v8 = vmul.f32 0.5, %v1909_v33 }
 0x47e   :  { %v2037_v49 = vadd.f32 1.0, %v3502_v16  ;;  %3511 = verf.f32 %v1980_v10  ;;  %2997 = vmatprep.mubr.f32.mxu0 %v2067_v9 }
 0x47f   :  { %3513 = verf.f32 %v1979_v44  ;;  %2998 = vmatmul.mubr.f32.gmra.mrb[70].mxu0 %v2068_v18  ;;  %v2070_v15 = vmul.f32 %v2038_v60, %v1942_v3 }
 0x480   :  { %v3504_v54 = vpop.eup %3503  ;;  %v2069_v56 = vmul.f32 %v2037_v49, %v1941_v12 }
 0x481   :  { %v3506_v4 = vpop.eup %3505  ;;  %v2040_v2 = vadd.f32 1.0, %v3504_v54 }
 0x482   :  { %v2039_v26 = vadd.f32 1.0, %v3506_v4  ;;  %3000 = vmatprep.mubr.f32.mxu0 %v2069_v56 }
 0x483   :  { %3001 = vmatmul.mubr.f32.gmra.mrb[72].mxu0 %v2070_v15  ;;  %v2072_v6 = vmul.f32 %v2040_v2, %v1944_v43 }
 0x484   :  { %v3508_v48 = vpop.eup %3507  ;;  %v2071_v28 = vmul.f32 %v2039_v26, %v1943_v27 }
 0x485   :  { %v3510_v11 = vpop.eup %3509  ;;  %v2042_v63 = vadd.f32 1.0, %v3508_v48 }
 0x486   :  { %v2041_v41 = vadd.f32 1.0, %v3510_v11  ;;  %3003 = vmatprep.mubr.f32.mxu0 %v2071_v28 }
 0x487   :  { %3004 = vmatmul.mubr.f32.gmra.mrb[74].mxu0 %v2072_v6  ;;  %v2074_v37 = vmul.f32 %v2042_v63, %v1946_v58 }
 0x488   :  { %v3512_v24 = vpop.eup %3511  ;;  %v2073_v35 = vmul.f32 %v2041_v41, %v1945_v0 }
 0x489   :  { %v3514_v30 = vpop.eup %3513  ;;  %v2044_v36 = vadd.f32 1.0, %v3512_v24 }
 0x48a   :  { %v2043_v19 = vadd.f32 1.0, %v3514_v30  ;;  %3006 = vmatprep.mubr.f32.mxu0 %v2073_v35 }
 0x48b   :  { %3007 = vmatmul.mubr.f32.gmra.mrb[76].mxu0 %v2074_v37  ;;  %v2076_v17 = vmul.f32 %v2044_v36, %v1948_v25 }
 0x48c   :  { %v2075_v38 = vmul.f32 %v2043_v19, %v1947_v8 }
 0x48e   :  { %3009 = vmatprep.mubr.f32.mxu0 %v2075_v38 }
 0x48f   :  { %3010 = vmatmul.mubr.f32.gmra.mrb[78].mxu0 %v2076_v17 }
 0x526   :  { %v2966_v45 = vpop.f32.mrb[48].mxu0 }
 0x527   :  { %v2170_v31 = vadd.f32 %v2966_v45, %v4348_v40  ;;  %v2164_v59 = vpop.f32.mrb[49].mxu0 }
 0x528   :  { %v2165_v47 = vadd.f32 %v2164_v59, %v4348_v40 }
 0x529   :  { %2324 = vst [vmem:[#allocation5 + $0x8] sm:$0xff] %v2170_v31 }
 0x52a   :  { %2323 = vst [vmem:[#allocation5] sm:$0xff] %v2165_v47  ;;  %v2969_v13 = vpop.f32.mrb[50].mxu0 }
 0x52b   :  { %v2180_v20 = vadd.f32 %v2969_v13, %v4348_v40  ;;  %v2174_v29 = vpop.f32.mrb[51].mxu0 }
 0x52c   :  { %v2175_v42 = vadd.f32 %v2174_v29, %v4348_v40 }
 0x52d   :  { %2326 = vst [vmem:[#allocation5 + $0x18] sm:$0xff] %v2180_v20 }
 0x52e   :  { %2325 = vst [vmem:[#allocation5 + $0x10] sm:$0xff] %v2175_v42  ;;  %v2972_v61 = vpop.f32.mrb[52].mxu0 }
 0x52f   :  { %v2190_v39 = vadd.f32 %v2972_v61, %v4348_v40  ;;  %v2184_v57 = vpop.f32.mrb[53].mxu0 }
 0x530   :  { %v2185_v34 = vadd.f32 %v2184_v57, %v4348_v40 }
 0x531   :  { %2328 = vst [vmem:[#allocation5 + $0x28] sm:$0xff] %v2190_v39 }
 0x532   :  { %2327 = vst [vmem:[#allocation5 + $0x20] sm:$0xff] %v2185_v34  ;;  %v2975_v51 = vpop.f32.mrb[54].mxu0 }
 0x533   :  { %v2200_v52 = vadd.f32 %v2975_v51, %v4348_v40  ;;  %v2194_v53 = vpop.f32.mrb[55].mxu0 }
 0x534   :  { %v2195_v55 = vadd.f32 %v2194_v53, %v4348_v40 }
 0x535   :  { %2330 = vst [vmem:[#allocation5 + $0x38] sm:$0xff] %v2200_v52 }
 0x536   :  { %2329 = vst [vmem:[#allocation5 + $0x30] sm:$0xff] %v2195_v55  ;;  %v2978_v21 = vpop.f32.mrb[56].mxu0 }
 0x537   :  { %v2210_v1 = vadd.f32 %v2978_v21, %v4348_v40  ;;  %v2204_v32 = vpop.f32.mrb[57].mxu0 }
 0x538   :  { %v2205_v22 = vadd.f32 %v2204_v32, %v4348_v40 }
 0x539   :  { %2332 = vst [vmem:[#allocation5 + $0x48] sm:$0xff] %v2210_v1 }
 0x53a   :  { %2331 = vst [vmem:[#allocation5 + $0x40] sm:$0xff] %v2205_v22  ;;  %v2981_v50 = vpop.f32.mrb[58].mxu0 }
 0x53b   :  { %v2220_v62 = vadd.f32 %v2981_v50, %v4348_v40  ;;  %v2214_v23 = vpop.f32.mrb[59].mxu0 }
 0x53c   :  { %v2215_v5 = vadd.f32 %v2214_v23, %v4348_v40 }
 0x53d   :  { %2334 = vst [vmem:[#allocation5 + $0x58] sm:$0xff] %v2220_v62 }
 0x53e   :  { %2333 = vst [vmem:[#allocation5 + $0x50] sm:$0xff] %v2215_v5  ;;  %v2984_v46 = vpop.f32.mrb[60].mxu0 }
 0x53f   :  { %v2230_v33 = vadd.f32 %v2984_v46, %v4348_v40  ;;  %v2224_v7 = vpop.f32.mrb[61].mxu0 }
 0x540   :  { %v2225_v10 = vadd.f32 %v2224_v7, %v4348_v40 }
 0x541   :  { %2336 = vst [vmem:[#allocation5 + $0x68] sm:$0xff] %v2230_v33 }
 0x542   :  { %2335 = vst [vmem:[#allocation5 + $0x60] sm:$0xff] %v2225_v10  ;;  %v2987_v9 = vpop.f32.mrb[62].mxu0 }
 0x543   :  { %v2240_v16 = vadd.f32 %v2987_v9, %v4348_v40  ;;  %v2234_v60 = vpop.f32.mrb[63].mxu0 }
 0x544   :  { %v2235_v44 = vadd.f32 %v2234_v60, %v4348_v40 }
 0x545   :  { %2338 = vst [vmem:[#allocation5 + $0x78] sm:$0xff] %v2240_v16 }
 0x546   :  { %2337 = vst [vmem:[#allocation5 + $0x70] sm:$0xff] %v2235_v44  ;;  %v2990_v18 = vpop.f32.mrb[64].mxu0 }
 0x547   :  { %v2250_v12 = vadd.f32 %v2990_v18, %v4348_v40  ;;  %v2244_v49 = vpop.f32.mrb[65].mxu0 }
 0x548   :  { %v2245_v3 = vadd.f32 %v2244_v49, %v4348_v40 }
 0x549   :  { %2340 = vst [vmem:[#allocation5 + $0x88] sm:$0xff] %v2250_v12 }
 0x54a   :  { %2339 = vst [vmem:[#allocation5 + $0x80] sm:$0xff] %v2245_v3  ;;  %v2993_v54 = vpop.f32.mrb[66].mxu0 }
 0x54b   :  { %v2260_v56 = vadd.f32 %v2993_v54, %v4348_v40  ;;  %v2254_v4 = vpop.f32.mrb[67].mxu0 }
 0x54c   :  { %v2255_v2 = vadd.f32 %v2254_v4, %v4348_v40 }
 0x54d   :  { %2342 = vst [vmem:[#allocation5 + $0x98] sm:$0xff] %v2260_v56 }
 0x54e   :  { %2341 = vst [vmem:[#allocation5 + $0x90] sm:$0xff] %v2255_v2  ;;  %v2996_v15 = vpop.f32.mrb[68].mxu0 }
 0x54f   :  { %v2270_v27 = vadd.f32 %v2996_v15, %v4348_v40  ;;  %v2264_v26 = vpop.f32.mrb[69].mxu0 }
 0x550   :  { %v2265_v43 = vadd.f32 %v2264_v26, %v4348_v40 }
 0x551   :  { %2344 = vst [vmem:[#allocation5 + $0xa8] sm:$0xff] %v2270_v27 }
 0x552   :  { %2343 = vst [vmem:[#allocation5 + $0xa0] sm:$0xff] %v2265_v43  ;;  %v2999_v48 = vpop.f32.mrb[70].mxu0 }
 0x553   :  { %v2280_v28 = vadd.f32 %v2999_v48, %v4348_v40  ;;  %v2274_v11 = vpop.f32.mrb[71].mxu0 }
 0x554   :  { %v2275_v63 = vadd.f32 %v2274_v11, %v4348_v40 }
 0x555   :  { %2346 = vst [vmem:[#allocation5 + $0xb8] sm:$0xff] %v2280_v28 }
 0x556   :  { %2345 = vst [vmem:[#allocation5 + $0xb0] sm:$0xff] %v2275_v63  ;;  %v3002_v6 = vpop.f32.mrb[72].mxu0 }
 0x557   :  { %v2290_v0 = vadd.f32 %v3002_v6, %v4348_v40  ;;  %v2284_v41 = vpop.f32.mrb[73].mxu0 }
 0x558   :  { %v2285_v58 = vadd.f32 %v2284_v41, %v4348_v40 }
 0x559   :  { %2348 = vst [vmem:[#allocation5 + $0xc8] sm:$0xff] %v2290_v0 }
 0x55a   :  { %2347 = vst [vmem:[#allocation5 + $0xc0] sm:$0xff] %v2285_v58  ;;  %v3005_v24 = vpop.f32.mrb[74].mxu0 }
 0x55b   :  { %v2300_v35 = vadd.f32 %v3005_v24, %v4348_v40  ;;  %v2294_v30 = vpop.f32.mrb[75].mxu0 }
 0x55c   :  { %v2295_v36 = vadd.f32 %v2294_v30, %v4348_v40 }
 0x55d   :  { %2350 = vst [vmem:[#allocation5 + $0xd8] sm:$0xff] %v2300_v35 }
 0x55e   :  { %2349 = vst [vmem:[#allocation5 + $0xd0] sm:$0xff] %v2295_v36  ;;  %v3008_v37 = vpop.f32.mrb[76].mxu0 }
 0x55f   :  { %v2310_v8 = vadd.f32 %v3008_v37, %v4348_v40  ;;  %v2304_v19 = vpop.f32.mrb[77].mxu0 }
 0x560   :  { %v2305_v25 = vadd.f32 %v2304_v19, %v4348_v40 }
 0x561   :  { %2352 = vst [vmem:[#allocation5 + $0xe8] sm:$0xff] %v2310_v8 }
 0x562   :  { %2351 = vst [vmem:[#allocation5 + $0xe0] sm:$0xff] %v2305_v25  ;;  %v3011_v38 = vpop.f32.mrb[78].mxu0 }
 0x563   :  { %v2320_v17 = vadd.f32 %v3011_v38, %v4348_v40  ;;  %v2314_v14 = vpop.f32.mrb[79].mxu0 }
 0x564   :  { %v2315_v45 = vadd.f32 %v2314_v14, %v4348_v40 }
 0x565   :  { %2354 = vst [vmem:[#allocation5 + $0xf8] sm:$0xff] %v2320_v17 }
 0x566   :  { %2353 = vst [vmem:[#allocation5 + $0xf0] sm:$0xff] %v2315_v45 }
 0x567   :  { %3550 = shalt.err (!%p3547_p12)
}
 0x568   :  { %s3551_s19 = scalar_lea.hbm %s4400_s3, 4096 }
 0x569   :  { %p3552_p13 = scmp.ne.s32.totalorder %s4400_s3, %s3551_s19  ;;  %p3555_p0 = scmp.lt.u32.totalorder %s3551_s19, %s4400_s3 }
 0x56b   :  { %p3557_p1 = pnand %p3555_p0, %p3552_p13 }
 0x56d   :  { %3560 = shalt.err (!%p3557_p1)
}
 0x56e   :  { %2366 = dma.vmem_to_hbm [thread:$0]  %s2361_s15, 4096, %s4400_s3, [#allocation4], %s3566_s22, %s3566_s22, %s3567_s23  }
 0x56f   :  { %3563 = dma.done.wait [#allocation4], 4096  }
 0x570   :  { %3564 = vsyncadd [#allocation4], 4294963200 }
 0x571   :  { %2370 = vsyncpa [#allocation3], 1 }
 0x572   :  { %2371 = vsyncpa [#allocation4], 1 }

</bundles_post_ra>
